<compile_context>
chip_gen: v7x
topology: tpu7x:2x2x1
jax: 0.10.0
libtpu: 0.0.40
codegen_flags: <defaults>
</compile_context>

<pallas_src>
import functools

import jax
import jax.numpy as jnp
from jax.experimental import pallas as pl
from jax.experimental.pallas import tpu as pltpu


# Layer-stacked parameter keys, in kernel argument order.
_WKEYS = ("wqkv", "bqkv", "wo", "bo", "ln1g", "ln1b",
          "w1", "b1", "w2", "b2", "ln2g", "ln2b")


# --------------------------------------------------------------------------
# Fused encoder + logits kernel (grid = (batch_block,); layers unrolled inside)
# --------------------------------------------------------------------------
def sasrec_kernel(x_ref, kp_ref, pn_ref,
                  wqkv_ref, bqkv_ref, wo_ref, bo_ref,
                  ln1g_ref, ln1b_ref, w1_ref, b1_ref, w2_ref, b2_ref,
                  ln2g_ref, ln2b_ref,
                  out_ref, *, num_heads, d_model):
    Bb, L, Dp = x_ref.shape              # Dp = lane-padded hidden (128)
    H = num_heads
    D = d_model                          # real hidden (LN statistics divide by D)
    Dh = D // H                          # real head dim (softmax scale)
    Dhp = Dp // H                        # padded head dim (lane slice width)
    n_layers = wqkv_ref.shape[0]
    scale = 1.0 / float(Dh) ** 0.5
    inv_d = 1.0 / float(D)

    # ---- layer-invariant additive attention bias, built once (no (B,L,L) DMA) --
    row = jax.lax.broadcasted_iota(jnp.int32, (L, L), 0)
    col = jax.lax.broadcasted_iota(jnp.int32, (L, L), 1)
    causal_bias = jnp.where(col <= row, 0.0, -1e9).astype(jnp.float32)   # (L, L)
    bias = causal_bias[None, :, :] + kp_ref[...]                         # (Bb, L, L)

    # activation carried as a value across layers (no scratch round-trip)
    h2d = x_ref[...].reshape(Bb * L, Dp)                                 # f32

    def layer_norm(h, g, b):
        # Padded lanes of h are exactly 0, so sums over Dp == sums over D;
        # divide by the real D.  gamma/beta are 0 in padded lanes, keeping
        # the padded lanes of the output exactly 0.
        mu = jnp.sum(h, axis=-1, keepdims=True) * inv_d
        var = jnp.sum(h * h, axis=-1, keepdims=True) * inv_d - mu * mu
        return (h - mu) * jax.lax.rsqrt(var + 1e-5) * g + b

    for l in range(n_layers):            # static, fully-unrolled layer loop
        hb = h2d.astype(jnp.bfloat16)

        # ---- fused Q/K/V: ONE (Bb*L, Dp) @ (Dp, 3*Dp) matmul ----
        qkv = jnp.dot(hb, wqkv_ref[l],
                      preferred_element_type=jnp.float32) + bqkv_ref[l]   # (Bb*L, 3*Dp)

        # ---- per-head attention on 128-aligned lane slices of qkv ----
        ctx_heads = []
        for h_ in range(H):
            qh = qkv[:, h_ * Dhp:(h_ + 1) * Dhp].reshape(Bb, L, Dhp)
            kh = qkv[:, Dp + h_ * Dhp: Dp + (h_ + 1) * Dhp].reshape(Bb, L, Dhp)
            vh = qkv[:, 2 * Dp + h_ * Dhp: 2 * Dp + (h_ + 1) * Dhp].reshape(Bb, L, Dhp)
            s = jnp.einsum("bld,bmd->blm",
                           qh.astype(jnp.bfloat16), kh.astype(jnp.bfloat16),
                           preferred_element_type=jnp.float32)
            s = s * scale + bias
            s = s - jnp.max(s, axis=-1, keepdims=True)
            p = jnp.exp(s)
            p = p * pl.reciprocal(jnp.sum(p, axis=-1, keepdims=True), approx=True)
            ctx_heads.append(
                jnp.einsum("blm,bmd->bld",
                           p.astype(jnp.bfloat16), vh.astype(jnp.bfloat16),
                           preferred_element_type=jnp.float32))
        ctx = jnp.concatenate(ctx_heads, axis=-1).reshape(Bb * L, Dp)

        # ---- single output projection ----
        attn = jnp.dot(ctx.astype(jnp.bfloat16), wo_ref[l],
                       preferred_element_type=jnp.float32) + bo_ref[l]

        # ---- residual + LayerNorm 1 (post-LN) ----
        h1 = layer_norm(h2d + attn, ln1g_ref[l], ln1b_ref[l])

        # ---- position-wise feed-forward (ReLU, exp_factor expansion) ----
        f = jnp.dot(h1.astype(jnp.bfloat16), w1_ref[l],
                    preferred_element_type=jnp.float32) + b1_ref[l]
        f = jnp.maximum(f, 0.0)
        f = jnp.dot(f.astype(jnp.bfloat16), w2_ref[l],
                    preferred_element_type=jnp.float32) + b2_ref[l]

        # ---- residual + LayerNorm 2 ----
        h2d = layer_norm(h1 + f, ln2g_ref[l], ln2b_ref[l])

    # ---- fused pos/neg dot-product logits: (Bb, 2, L) ----
    out3d = h2d.reshape(Bb, L, Dp)
    out_ref[...] = jnp.sum(out3d[:, None, :, :] * pn_ref[...], axis=-1)


# --------------------------------------------------------------------------
# Wrapper
# --------------------------------------------------------------------------
def _choose_batch_block(B, L, target_rows=512):
    """Pick Bb so Bb*L fills the MXU M dim (512 rows on v6e/v7x; 256 is also
    fine on v5e), while keeping >=2 grid steps so v7x can split the parallel
    batch axis across its two TensorCores."""
    bb = max(1, min(B, target_rows // max(L, 1)))
    while B % bb != 0:
        bb -= 1
    if B // bb < 2 and bb > 1:
        bb = max(1, bb // 2)
        while B % bb != 0:
            bb -= 1
    return bb


def sasrec_encoder(x, kp_bias, pn_embs, layers, num_heads, d_model):
    """x: (B,L,Dp) f32 lane-padded; kp_bias: (B,1,L) f32 additive (0/-1e9);
    pn_embs: (B,2,L,Dp) f32 (pos stacked with neg); layers: layer-stacked,
    lane-padded parameters."""
    B, L, Dp = x.shape
    Bb = _choose_batch_block(B, L)
    n_batch_blocks = B // Bb

    act_spec = pl.BlockSpec((Bb, L, Dp), lambda b: (b, 0, 0))
    kp_spec = pl.BlockSpec((Bb, 1, L), lambda b: (b, 0, 0))
    pn_spec = pl.BlockSpec((Bb, 2, L, Dp), lambda b: (b, 0, 0, 0))
    out_spec = pl.BlockSpec((Bb, 2, L), lambda b: (b, 0, 0))

    def whole_spec(arr):                 # all layers' weights, VMEM-resident
        nd = arr.ndim
        return pl.BlockSpec(arr.shape, lambda b, nd=nd: (0,) * nd)

    in_specs = [act_spec, kp_spec, pn_spec] + [whole_spec(layers[k]) for k in _WKEYS]

    kernel = functools.partial(sasrec_kernel, num_heads=num_heads, d_model=d_model)

    logits = pl.pallas_call(
        kernel,
        out_shape=jax.ShapeDtypeStruct((B, 2, L), jnp.float32),
        grid=(n_batch_blocks,),
        in_specs=in_specs,
        out_specs=out_spec,
        compiler_params=pltpu.CompilerParams(
            dimension_semantics=("parallel",),
            # Explicit VMEM budget (actual use is well under 1 MiB at these
            # shapes; 32 MiB is safe on v5e/v6e/v7x).
            vmem_limit_bytes=32 * 1024 * 1024),
    )(x, kp_bias, pn_embs, *[layers[k] for k in _WKEYS])

    return logits[:, 0, :], logits[:, 1, :]


@functools.partial(jax.jit, static_argnames=("num_heads",))
def sasrec_forward(params, seq, pos_seqs, neg_seqs, *, num_heads):
    """SASRec.forward: returns (pos_logits, neg_logits), each (B, L)."""
    emb = params["emb_loc"]                                   # (n_item+1, D), row 0 == 0
    B, L = seq.shape
    D = emb.shape[1]
    Dp = params["layers"]["wo"].shape[-1]                     # padded lane width (128)

    # emb_loc(seq) + positional embedding (PositionalEmbedding.forward),
    # then zero-pad the hidden dim to Dp lanes (mathematically inert).
    x = emb[seq] + params["pos_emb"][:L][None, :, :]          # (B, L, D)
    x = jnp.pad(x, ((0, 0), (0, 0), (0, Dp - D)))             # (B, L, Dp)

    # get_mask(seq, bidirectional=False): key-pad additive bias, causal part
    # is built in-kernel.
    kp_bias = jnp.where(seq != 0, 0.0, -1e9).astype(jnp.float32)[:, None, :]   # (B,1,L)

    # pos/neg embeddings stacked into one input (one DMA stream, one output).
    pn = jnp.stack([emb[pos_seqs], emb[neg_seqs]], axis=1)    # (B, 2, L, D)
    pn = jnp.pad(pn, ((0, 0), (0, 0), (0, 0), (0, Dp - D)))   # (B, 2, L, Dp)

    return sasrec_encoder(x, kp_bias, pn, params["layers"], num_heads, D)


# --------------------------------------------------------------------------
# Deterministic parameter init (synthetic, matching __init__ shapes), laid out
# lane-padded / head-major for the kernel.
# --------------------------------------------------------------------------
def init_params(key, n_item, D, H, F, maxlen, num_blocks, Dp=128, Fp=128):
    assert D % H == 0 and Dp % H == 0 and Dp >= D and Fp >= F
    Dh, Dhp = D // H, Dp // H

    keys = jax.random.split(key, 2 + num_blocks)
    emb = 0.02 * jax.random.normal(keys[0], (n_item + 1, D), jnp.float32)
    emb = emb.at[0].set(0.0)                                  # padding_idx=0
    pos_emb = 0.02 * jax.random.normal(keys[1], (maxlen, D), jnp.float32)

    def pad_rows(w, to):
        return jnp.pad(w, ((0, to - w.shape[0]), (0, 0)))

    def pad_cols(w, to):
        return jnp.pad(w, ((0, 0), (0, to - w.shape[1])))

    def head_pad_cols(w):   # (rows, H*Dh) -> (rows, H*Dhp), head-major slots
        r = w.shape[0]
        return jnp.pad(w.reshape(r, H, Dh),
                       ((0, 0), (0, 0), (0, Dhp - Dh))).reshape(r, H * Dhp)

    def head_pad_rows(w):   # (H*Dh, cols) -> (H*Dhp, cols), head-major slots
        c = w.shape[1]
        return jnp.pad(w.reshape(H, Dh, c),
                       ((0, 0), (0, Dhp - Dh), (0, 0))).reshape(H * Dhp, c)

    def one_block(k):
        ks = jax.random.split(k, 6)
        s = 0.1
        wq, wk, wv = (s * jax.random.normal(ks[i], (D, D), jnp.float32) for i in range(3))
        wo = s * jax.random.normal(ks[3], (D, D), jnp.float32)
        w1 = s * jax.random.normal(ks[4], (D, F), jnp.float32)
        w2 = s * jax.random.normal(ks[5], (F, D), jnp.float32)

        # fused QKV: columns = [Q heads | K heads | V heads], each head slot
        # zero-padded Dh -> Dhp; rows zero-padded D -> Dp.
        wqkv_p = jnp.concatenate(
            [pad_rows(head_pad_cols(w), Dp) for w in (wq, wk, wv)], axis=1)   # (Dp, 3*Dp)
        # output projection: rows head-major padded (matches ctx lanes),
        # columns zero beyond D so padded output lanes stay 0.
        wo_p = pad_cols(head_pad_rows(wo), Dp)                                 # (Dp, Dp)
        # LN gamma: ones over real D, zeros in padded lanes (keeps them 0).
        gamma = jnp.pad(jnp.ones((1, D), jnp.float32), ((0, 0), (0, Dp - D)))

        return dict(
            wqkv=wqkv_p.astype(jnp.bfloat16),
            bqkv=jnp.zeros((1, 3 * Dp), jnp.float32),
            wo=wo_p.astype(jnp.bfloat16),
            bo=jnp.zeros((1, Dp), jnp.float32),
            ln1g=gamma, ln1b=jnp.zeros((1, Dp), jnp.float32),
            w1=pad_cols(pad_rows(w1, Dp), Fp).astype(jnp.bfloat16),           # (Dp, Fp)
            b1=jnp.zeros((1, Fp), jnp.float32),
            w2=pad_cols(pad_rows(w2, Fp), Dp).astype(jnp.bfloat16),           # (Fp, Dp)
            b2=jnp.zeros((1, Dp), jnp.float32),
            ln2g=gamma, ln2b=jnp.zeros((1, Dp), jnp.float32),
        )

    blocks = [one_block(keys[2 + i]) for i in range(num_blocks)]
    layers = {k: jnp.stack([b[k] for b in blocks]) for k in blocks[0]}
    return dict(emb_loc=emb, pos_emb=pos_emb, layers=layers)


# --------------------------------------------------------------------------
if __name__ == "__main__":
    B, L, D = 2, 8, 32          # batch, maxlen, hidden_units
    H, EXP = 2, 2               # num_heads, exp_factor
    F = EXP * D
    n_item = 50
    num_blocks = 2

    key = jax.random.PRNGKey(0)
    kparam, kdata = jax.random.split(key)
    params = init_params(kparam, n_item, D, H, F, L, num_blocks)

    k1, k2, k3 = jax.random.split(kdata, 3)
    seq = jax.random.randint(k1, (B, L), 1, n_item + 1).astype(jnp.int32)
    seq = seq.at[:, :2].set(0)  # leading padding to exercise the key-pad mask
    pos_seqs = jax.random.randint(k2, (B, L), 1, n_item + 1).astype(jnp.int32)
    neg_seqs = jax.random.randint(k3, (B, L), 1, n_item + 1).astype(jnp.int32)

    pos_logits, neg_logits = sasrec_forward(params, seq, pos_seqs, neg_seqs,
                                            num_heads=H)
    jax.block_until_ready((pos_logits, neg_logits))
    assert pos_logits.shape == (B, L) and neg_logits.shape == (B, L)
    assert bool(jnp.all(jnp.isfinite(pos_logits))) and bool(jnp.all(jnp.isfinite(neg_logits)))
    print("KERNEL_OK")
</pallas_src>

<mosaic_0001>
module attributes {stable_mosaic.version = 11 : i64} {
  func.func @sasrec_kernel(%arg0: i32, %arg1: memref<1x8x128xf32, #tpu.memory_space<vmem>>, %arg2: memref<1x1x8xf32, #tpu.memory_space<vmem>>, %arg3: memref<1x2x8x128xf32, #tpu.memory_space<vmem>>, %arg4: memref<2x128x384xbf16, #tpu.memory_space<vmem>>, %arg5: memref<2x1x384xf32, #tpu.memory_space<vmem>>, %arg6: memref<2x128x128xbf16, #tpu.memory_space<vmem>>, %arg7: memref<2x1x128xf32, #tpu.memory_space<vmem>>, %arg8: memref<2x1x128xf32, #tpu.memory_space<vmem>>, %arg9: memref<2x1x128xf32, #tpu.memory_space<vmem>>, %arg10: memref<2x128x128xbf16, #tpu.memory_space<vmem>>, %arg11: memref<2x1x128xf32, #tpu.memory_space<vmem>>, %arg12: memref<2x128x128xbf16, #tpu.memory_space<vmem>>, %arg13: memref<2x1x128xf32, #tpu.memory_space<vmem>>, %arg14: memref<2x1x128xf32, #tpu.memory_space<vmem>>, %arg15: memref<2x1x128xf32, #tpu.memory_space<vmem>>, %arg16: memref<1x2x8xf32, #tpu.memory_space<vmem>>) attributes {dimension_semantics = [#tpu.dimension_semantics<parallel>], iteration_bounds = array<i64: 2>, scalar_prefetch = 0 : i64, scratch_operands = 0 : i64, tpu.core_type = #tpu.core_type<tc>, window_params = [{transform_indices = @transform_0, window_bounds = array<i64: 1, 8, 128>}, {transform_indices = @transform_1, window_bounds = array<i64: 1, 1, 8>}, {transform_indices = @transform_2, window_bounds = array<i64: 1, 2, 8, 128>}, {pipeline_mode = #tpu.pipeline_mode<synchronous>, transform_indices = @transform_3, window_bounds = array<i64: 2, 128, 384>}, {pipeline_mode = #tpu.pipeline_mode<synchronous>, transform_indices = @transform_4, window_bounds = array<i64: 2, 1, 384>}, {pipeline_mode = #tpu.pipeline_mode<synchronous>, transform_indices = @transform_5, window_bounds = array<i64: 2, 128, 128>}, {pipeline_mode = #tpu.pipeline_mode<synchronous>, transform_indices = @transform_6, window_bounds = array<i64: 2, 1, 128>}, {pipeline_mode = #tpu.pipeline_mode<synchronous>, transform_indices = @transform_7, window_bounds = array<i64: 2, 1, 128>}, {pipeline_mode = #tpu.pipeline_mode<synchronous>, transform_indices = @transform_8, window_bounds = array<i64: 2, 1, 128>}, {pipeline_mode = #tpu.pipeline_mode<synchronous>, transform_indices = @transform_9, window_bounds = array<i64: 2, 128, 128>}, {pipeline_mode = #tpu.pipeline_mode<synchronous>, transform_indices = @transform_10, window_bounds = array<i64: 2, 1, 128>}, {pipeline_mode = #tpu.pipeline_mode<synchronous>, transform_indices = @transform_11, window_bounds = array<i64: 2, 128, 128>}, {pipeline_mode = #tpu.pipeline_mode<synchronous>, transform_indices = @transform_12, window_bounds = array<i64: 2, 1, 128>}, {pipeline_mode = #tpu.pipeline_mode<synchronous>, transform_indices = @transform_13, window_bounds = array<i64: 2, 1, 128>}, {pipeline_mode = #tpu.pipeline_mode<synchronous>, transform_indices = @transform_14, window_bounds = array<i64: 2, 1, 128>}, {transform_indices = @transform_15, window_bounds = array<i64: 1, 2, 8>}]} {
    %0 = tpu.iota {dimensions = array<i32: 0>} : vector<8x8xi32>
    %1 = tpu.iota {dimensions = array<i32: 1>} : vector<8x8xi32>
    %2 = arith.cmpi sle, %1, %0 : vector<8x8xi32>
    %cst = arith.constant 0.000000e+00 : f32
    %cst_0 = arith.constant -1.000000e+09 : f32
    %3 = vector.broadcast %cst : f32 to vector<8x8xf32>
    %4 = vector.broadcast %cst_0 : f32 to vector<8x8xf32>
    %5 = arith.select %2, %3, %4 : vector<8x8xi1>, vector<8x8xf32>
    %6 = vector.shape_cast %5 : vector<8x8xf32> to vector<1x8x8xf32>
    %c0 = arith.constant 0 : index
    %c0_1 = arith.constant 0 : index
    %c0_2 = arith.constant 0 : index
    %7 = vector.load %arg2[%c0, %c0_1, %c0_2] : memref<1x1x8xf32, #tpu.memory_space<vmem>>, vector<1x1x8xf32>
    %8 = vector.broadcast %7 : vector<1x1x8xf32> to vector<1x8x8xf32>
    %9 = arith.addf %6, %8 : vector<1x8x8xf32>
    %c0_3 = arith.constant 0 : index
    %c0_4 = arith.constant 0 : index
    %c0_5 = arith.constant 0 : index
    %10 = vector.load %arg1[%c0_3, %c0_4, %c0_5] : memref<1x8x128xf32, #tpu.memory_space<vmem>>, vector<1x8x128xf32>
    %11 = vector.shape_cast %10 : vector<1x8x128xf32> to vector<8x128xf32>
    %12 = arith.truncf %11 : vector<8x128xf32> to vector<8x128xbf16>
    %c0_6 = arith.constant 0 : index
    %c0_7 = arith.constant 0 : index
    %c0_8 = arith.constant 0 : index
    %13 = vector.load %arg4[%c0_6, %c0_7, %c0_8] : memref<2x128x384xbf16, #tpu.memory_space<vmem>>, vector<1x128x384xbf16>
    %14 = vector.shape_cast %13 : vector<1x128x384xbf16> to vector<128x384xbf16>
    %cst_9 = arith.constant dense<0.000000e+00> : vector<8x384xf32>
    %15 = tpu.matmul %12, %14, %cst_9 {dimension_numbers = #tpu.dot_dimension_numbers<[1], [0], [0], [1], [0, 0, 1, 1], [], []>} : vector<8x128xbf16>, vector<128x384xbf16>, vector<8x384xf32> -> vector<8x384xf32>
    %c0_10 = arith.constant 0 : index
    %c0_11 = arith.constant 0 : index
    %c0_12 = arith.constant 0 : index
    %16 = vector.load %arg5[%c0_10, %c0_11, %c0_12] : memref<2x1x384xf32, #tpu.memory_space<vmem>>, vector<1x1x384xf32>
    %17 = vector.shape_cast %16 : vector<1x1x384xf32> to vector<1x384xf32>
    %18 = vector.broadcast %17 : vector<1x384xf32> to vector<8x384xf32>
    %19 = arith.addf %15, %18 : vector<8x384xf32>
    %20 = vector.extract_strided_slice %19 {offsets = [0, 0], sizes = [8, 64], strides = [1, 1]} : vector<8x384xf32> to vector<8x64xf32>
    %21 = vector.shape_cast %20 : vector<8x64xf32> to vector<1x8x64xf32>
    %22 = vector.extract_strided_slice %19 {offsets = [0, 128], sizes = [8, 64], strides = [1, 1]} : vector<8x384xf32> to vector<8x64xf32>
    %23 = vector.shape_cast %22 : vector<8x64xf32> to vector<1x8x64xf32>
    %24 = vector.extract_strided_slice %19 {offsets = [0, 256], sizes = [8, 64], strides = [1, 1]} : vector<8x384xf32> to vector<8x64xf32>
    %25 = vector.shape_cast %24 : vector<8x64xf32> to vector<1x8x64xf32>
    %26 = arith.truncf %21 : vector<1x8x64xf32> to vector<1x8x64xbf16>
    %27 = arith.truncf %23 : vector<1x8x64xf32> to vector<1x8x64xbf16>
    "tpu.trace_start"() <{level = 10 : i32, message = "bld,bmd->blm"}> : () -> ()
    %cst_13 = arith.constant dense<0.000000e+00> : vector<1x8x8xf32>
    %28 = tpu.matmul %26, %27, %cst_13 {dimension_numbers = #tpu.dot_dimension_numbers<[2], [2], [1], [1], [0, 0, 0, 1, 1, 1], [0], [0]>} : vector<1x8x64xbf16>, vector<1x8x64xbf16>, vector<1x8x8xf32> -> vector<1x8x8xf32>
    "tpu.trace_stop"() : () -> ()
    %cst_14 = arith.constant 2.500000e-01 : f32
    %29 = vector.broadcast %cst_14 : f32 to vector<1x8x8xf32>
    %30 = arith.mulf %28, %29 : vector<1x8x8xf32>
    %31 = arith.addf %30, %9 : vector<1x8x8xf32>
    %cst_15 = arith.constant dense<0xFF800000> : vector<1x8xf32>
    %32 = vector.multi_reduction <maximumf>, %31, %cst_15 [2] : vector<1x8x8xf32> to vector<1x8xf32>
    %33 = vector.shape_cast %32 : vector<1x8xf32> to vector<1x8x1xf32>
    %34 = vector.broadcast %33 : vector<1x8x1xf32> to vector<1x8x8xf32>
    %35 = arith.subf %31, %34 : vector<1x8x8xf32>
    %36 = math.exp %35 : vector<1x8x8xf32>
    %cst_16 = arith.constant dense<0.000000e+00> : vector<1x8xf32>
    %37 = vector.multi_reduction <add>, %36, %cst_16 [2] : vector<1x8x8xf32> to vector<1x8xf32>
    %38 = vector.shape_cast %37 : vector<1x8xf32> to vector<1x8x1xf32>
    %39 = tpu.reciprocal %38 {approx = true} : vector<1x8x1xf32> -> vector<1x8x1xf32>
    %40 = vector.broadcast %39 : vector<1x8x1xf32> to vector<1x8x8xf32>
    %41 = arith.mulf %36, %40 : vector<1x8x8xf32>
    %42 = arith.truncf %41 : vector<1x8x8xf32> to vector<1x8x8xbf16>
    %43 = arith.truncf %25 : vector<1x8x64xf32> to vector<1x8x64xbf16>
    "tpu.trace_start"() <{level = 10 : i32, message = "blm,bmd->bld"}> : () -> ()
    %cst_17 = arith.constant dense<0.000000e+00> : vector<1x8x64xf32>
    %44 = tpu.matmul %42, %43, %cst_17 {dimension_numbers = #tpu.dot_dimension_numbers<[2], [1], [1], [2], [0, 0, 0, 1, 1, 2], [0], [0]>} : vector<1x8x8xbf16>, vector<1x8x64xbf16>, vector<1x8x64xf32> -> vector<1x8x64xf32>
    "tpu.trace_stop"() : () -> ()
    %45 = vector.extract_strided_slice %19 {offsets = [0, 64], sizes = [8, 64], strides = [1, 1]} : vector<8x384xf32> to vector<8x64xf32>
    %46 = vector.shape_cast %45 : vector<8x64xf32> to vector<1x8x64xf32>
    %47 = vector.extract_strided_slice %19 {offsets = [0, 192], sizes = [8, 64], strides = [1, 1]} : vector<8x384xf32> to vector<8x64xf32>
    %48 = vector.shape_cast %47 : vector<8x64xf32> to vector<1x8x64xf32>
    %49 = vector.extract_strided_slice %19 {offsets = [0, 320], sizes = [8, 64], strides = [1, 1]} : vector<8x384xf32> to vector<8x64xf32>
    %50 = vector.shape_cast %49 : vector<8x64xf32> to vector<1x8x64xf32>
    %51 = arith.truncf %46 : vector<1x8x64xf32> to vector<1x8x64xbf16>
    %52 = arith.truncf %48 : vector<1x8x64xf32> to vector<1x8x64xbf16>
    "tpu.trace_start"() <{level = 10 : i32, message = "bld,bmd->blm"}> : () -> ()
    %cst_18 = arith.constant dense<0.000000e+00> : vector<1x8x8xf32>
    %53 = tpu.matmul %51, %52, %cst_18 {dimension_numbers = #tpu.dot_dimension_numbers<[2], [2], [1], [1], [0, 0, 0, 1, 1, 1], [0], [0]>} : vector<1x8x64xbf16>, vector<1x8x64xbf16>, vector<1x8x8xf32> -> vector<1x8x8xf32>
    "tpu.trace_stop"() : () -> ()
    %cst_19 = arith.constant 2.500000e-01 : f32
    %54 = vector.broadcast %cst_19 : f32 to vector<1x8x8xf32>
    %55 = arith.mulf %53, %54 : vector<1x8x8xf32>
    %56 = arith.addf %55, %9 : vector<1x8x8xf32>
    %cst_20 = arith.constant dense<0xFF800000> : vector<1x8xf32>
    %57 = vector.multi_reduction <maximumf>, %56, %cst_20 [2] : vector<1x8x8xf32> to vector<1x8xf32>
    %58 = vector.shape_cast %57 : vector<1x8xf32> to vector<1x8x1xf32>
    %59 = vector.broadcast %58 : vector<1x8x1xf32> to vector<1x8x8xf32>
    %60 = arith.subf %56, %59 : vector<1x8x8xf32>
    %61 = math.exp %60 : vector<1x8x8xf32>
    %cst_21 = arith.constant dense<0.000000e+00> : vector<1x8xf32>
    %62 = vector.multi_reduction <add>, %61, %cst_21 [2] : vector<1x8x8xf32> to vector<1x8xf32>
    %63 = vector.shape_cast %62 : vector<1x8xf32> to vector<1x8x1xf32>
    %64 = tpu.reciprocal %63 {approx = true} : vector<1x8x1xf32> -> vector<1x8x1xf32>
    %65 = vector.broadcast %64 : vector<1x8x1xf32> to vector<1x8x8xf32>
    %66 = arith.mulf %61, %65 : vector<1x8x8xf32>
    %67 = arith.truncf %66 : vector<1x8x8xf32> to vector<1x8x8xbf16>
    %68 = arith.truncf %50 : vector<1x8x64xf32> to vector<1x8x64xbf16>
    "tpu.trace_start"() <{level = 10 : i32, message = "blm,bmd->bld"}> : () -> ()
    %cst_22 = arith.constant dense<0.000000e+00> : vector<1x8x64xf32>
    %69 = tpu.matmul %67, %68, %cst_22 {dimension_numbers = #tpu.dot_dimension_numbers<[2], [1], [1], [2], [0, 0, 0, 1, 1, 2], [0], [0]>} : vector<1x8x8xbf16>, vector<1x8x64xbf16>, vector<1x8x64xf32> -> vector<1x8x64xf32>
    "tpu.trace_stop"() : () -> ()
    %70 = tpu.concatenate %44, %69 in 2 : vector<1x8x64xf32>, vector<1x8x64xf32> -> vector<1x8x128xf32>
    %71 = vector.shape_cast %70 : vector<1x8x128xf32> to vector<8x128xf32>
    %72 = arith.truncf %71 : vector<8x128xf32> to vector<8x128xbf16>
    %c0_23 = arith.constant 0 : index
    %c0_24 = arith.constant 0 : index
    %c0_25 = arith.constant 0 : index
    %73 = vector.load %arg6[%c0_23, %c0_24, %c0_25] : memref<2x128x128xbf16, #tpu.memory_space<vmem>>, vector<1x128x128xbf16>
    %74 = vector.shape_cast %73 : vector<1x128x128xbf16> to vector<128x128xbf16>
    %cst_26 = arith.constant dense<0.000000e+00> : vector<8x128xf32>
    %75 = tpu.matmul %72, %74, %cst_26 {dimension_numbers = #tpu.dot_dimension_numbers<[1], [0], [0], [1], [0, 0, 1, 1], [], []>} : vector<8x128xbf16>, vector<128x128xbf16>, vector<8x128xf32> -> vector<8x128xf32>
    %c0_27 = arith.constant 0 : index
    %c0_28 = arith.constant 0 : index
    %c0_29 = arith.constant 0 : index
    %76 = vector.load %arg7[%c0_27, %c0_28, %c0_29] : memref<2x1x128xf32, #tpu.memory_space<vmem>>, vector<1x1x128xf32>
    %77 = vector.shape_cast %76 : vector<1x1x128xf32> to vector<1x128xf32>
    %78 = vector.broadcast %77 : vector<1x128xf32> to vector<8x128xf32>
    %79 = arith.addf %75, %78 : vector<8x128xf32>
    %80 = arith.addf %11, %79 : vector<8x128xf32>
    %c0_30 = arith.constant 0 : index
    %c0_31 = arith.constant 0 : index
    %c0_32 = arith.constant 0 : index
    %81 = vector.load %arg8[%c0_30, %c0_31, %c0_32] : memref<2x1x128xf32, #tpu.memory_space<vmem>>, vector<1x1x128xf32>
    %82 = vector.shape_cast %81 : vector<1x1x128xf32> to vector<1x128xf32>
    %c0_33 = arith.constant 0 : index
    %c0_34 = arith.constant 0 : index
    %c0_35 = arith.constant 0 : index
    %83 = vector.load %arg9[%c0_33, %c0_34, %c0_35] : memref<2x1x128xf32, #tpu.memory_space<vmem>>, vector<1x1x128xf32>
    %84 = vector.shape_cast %83 : vector<1x1x128xf32> to vector<1x128xf32>
    %cst_36 = arith.constant dense<0.000000e+00> : vector<8xf32>
    %85 = vector.multi_reduction <add>, %80, %cst_36 [1] : vector<8x128xf32> to vector<8xf32>
    %86 = vector.shape_cast %85 : vector<8xf32> to vector<8x1xf32>
    %cst_37 = arith.constant 3.125000e-02 : f32
    %87 = vector.broadcast %cst_37 : f32 to vector<8x1xf32>
    %88 = arith.mulf %86, %87 : vector<8x1xf32>
    %89 = arith.mulf %80, %80 : vector<8x128xf32>
    %cst_38 = arith.constant dense<0.000000e+00> : vector<8xf32>
    %90 = vector.multi_reduction <add>, %89, %cst_38 [1] : vector<8x128xf32> to vector<8xf32>
    %91 = vector.shape_cast %90 : vector<8xf32> to vector<8x1xf32>
    %cst_39 = arith.constant 3.125000e-02 : f32
    %92 = vector.broadcast %cst_39 : f32 to vector<8x1xf32>
    %93 = arith.mulf %91, %92 : vector<8x1xf32>
    %94 = arith.mulf %88, %88 : vector<8x1xf32>
    %95 = arith.subf %93, %94 : vector<8x1xf32>
    %96 = vector.broadcast %88 : vector<8x1xf32> to vector<8x128xf32>
    %97 = arith.subf %80, %96 : vector<8x128xf32>
    %cst_40 = arith.constant 9.99999974E-6 : f32
    %98 = vector.broadcast %cst_40 : f32 to vector<8x1xf32>
    %99 = arith.addf %95, %98 : vector<8x1xf32>
    %100 = math.rsqrt %99 : vector<8x1xf32>
    %101 = vector.broadcast %100 : vector<8x1xf32> to vector<8x128xf32>
    %102 = arith.mulf %97, %101 : vector<8x128xf32>
    %103 = vector.broadcast %82 : vector<1x128xf32> to vector<8x128xf32>
    %104 = arith.mulf %102, %103 : vector<8x128xf32>
    %105 = vector.broadcast %84 : vector<1x128xf32> to vector<8x128xf32>
    %106 = arith.addf %104, %105 : vector<8x128xf32>
    %107 = arith.truncf %106 : vector<8x128xf32> to vector<8x128xbf16>
    %c0_41 = arith.constant 0 : index
    %c0_42 = arith.constant 0 : index
    %c0_43 = arith.constant 0 : index
    %108 = vector.load %arg10[%c0_41, %c0_42, %c0_43] : memref<2x128x128xbf16, #tpu.memory_space<vmem>>, vector<1x128x128xbf16>
    %109 = vector.shape_cast %108 : vector<1x128x128xbf16> to vector<128x128xbf16>
    %cst_44 = arith.constant dense<0.000000e+00> : vector<8x128xf32>
    %110 = tpu.matmul %107, %109, %cst_44 {dimension_numbers = #tpu.dot_dimension_numbers<[1], [0], [0], [1], [0, 0, 1, 1], [], []>} : vector<8x128xbf16>, vector<128x128xbf16>, vector<8x128xf32> -> vector<8x128xf32>
    %c0_45 = arith.constant 0 : index
    %c0_46 = arith.constant 0 : index
    %c0_47 = arith.constant 0 : index
    %111 = vector.load %arg11[%c0_45, %c0_46, %c0_47] : memref<2x1x128xf32, #tpu.memory_space<vmem>>, vector<1x1x128xf32>
    %112 = vector.shape_cast %111 : vector<1x1x128xf32> to vector<1x128xf32>
    %113 = vector.broadcast %112 : vector<1x128xf32> to vector<8x128xf32>
    %114 = arith.addf %110, %113 : vector<8x128xf32>
    %cst_48 = arith.constant 0.000000e+00 : f32
    %115 = vector.broadcast %cst_48 : f32 to vector<8x128xf32>
    %116 = arith.maximumf %114, %115 : vector<8x128xf32>
    %117 = arith.truncf %116 : vector<8x128xf32> to vector<8x128xbf16>
    %c0_49 = arith.constant 0 : index
    %c0_50 = arith.constant 0 : index
    %c0_51 = arith.constant 0 : index
    %118 = vector.load %arg12[%c0_49, %c0_50, %c0_51] : memref<2x128x128xbf16, #tpu.memory_space<vmem>>, vector<1x128x128xbf16>
    %119 = vector.shape_cast %118 : vector<1x128x128xbf16> to vector<128x128xbf16>
    %cst_52 = arith.constant dense<0.000000e+00> : vector<8x128xf32>
    %120 = tpu.matmul %117, %119, %cst_52 {dimension_numbers = #tpu.dot_dimension_numbers<[1], [0], [0], [1], [0, 0, 1, 1], [], []>} : vector<8x128xbf16>, vector<128x128xbf16>, vector<8x128xf32> -> vector<8x128xf32>
    %c0_53 = arith.constant 0 : index
    %c0_54 = arith.constant 0 : index
    %c0_55 = arith.constant 0 : index
    %121 = vector.load %arg13[%c0_53, %c0_54, %c0_55] : memref<2x1x128xf32, #tpu.memory_space<vmem>>, vector<1x1x128xf32>
    %122 = vector.shape_cast %121 : vector<1x1x128xf32> to vector<1x128xf32>
    %123 = vector.broadcast %122 : vector<1x128xf32> to vector<8x128xf32>
    %124 = arith.addf %120, %123 : vector<8x128xf32>
    %125 = arith.addf %106, %124 : vector<8x128xf32>
    %c0_56 = arith.constant 0 : index
    %c0_57 = arith.constant 0 : index
    %c0_58 = arith.constant 0 : index
    %126 = vector.load %arg14[%c0_56, %c0_57, %c0_58] : memref<2x1x128xf32, #tpu.memory_space<vmem>>, vector<1x1x128xf32>
    %127 = vector.shape_cast %126 : vector<1x1x128xf32> to vector<1x128xf32>
    %c0_59 = arith.constant 0 : index
    %c0_60 = arith.constant 0 : index
    %c0_61 = arith.constant 0 : index
    %128 = vector.load %arg15[%c0_59, %c0_60, %c0_61] : memref<2x1x128xf32, #tpu.memory_space<vmem>>, vector<1x1x128xf32>
    %129 = vector.shape_cast %128 : vector<1x1x128xf32> to vector<1x128xf32>
    %cst_62 = arith.constant dense<0.000000e+00> : vector<8xf32>
    %130 = vector.multi_reduction <add>, %125, %cst_62 [1] : vector<8x128xf32> to vector<8xf32>
    %131 = vector.shape_cast %130 : vector<8xf32> to vector<8x1xf32>
    %cst_63 = arith.constant 3.125000e-02 : f32
    %132 = vector.broadcast %cst_63 : f32 to vector<8x1xf32>
    %133 = arith.mulf %131, %132 : vector<8x1xf32>
    %134 = arith.mulf %125, %125 : vector<8x128xf32>
    %cst_64 = arith.constant dense<0.000000e+00> : vector<8xf32>
    %135 = vector.multi_reduction <add>, %134, %cst_64 [1] : vector<8x128xf32> to vector<8xf32>
    %136 = vector.shape_cast %135 : vector<8xf32> to vector<8x1xf32>
    %cst_65 = arith.constant 3.125000e-02 : f32
    %137 = vector.broadcast %cst_65 : f32 to vector<8x1xf32>
    %138 = arith.mulf %136, %137 : vector<8x1xf32>
    %139 = arith.mulf %133, %133 : vector<8x1xf32>
    %140 = arith.subf %138, %139 : vector<8x1xf32>
    %141 = vector.broadcast %133 : vector<8x1xf32> to vector<8x128xf32>
    %142 = arith.subf %125, %141 : vector<8x128xf32>
    %cst_66 = arith.constant 9.99999974E-6 : f32
    %143 = vector.broadcast %cst_66 : f32 to vector<8x1xf32>
    %144 = arith.addf %140, %143 : vector<8x1xf32>
    %145 = math.rsqrt %144 : vector<8x1xf32>
    %146 = vector.broadcast %145 : vector<8x1xf32> to vector<8x128xf32>
    %147 = arith.mulf %142, %146 : vector<8x128xf32>
    %148 = vector.broadcast %127 : vector<1x128xf32> to vector<8x128xf32>
    %149 = arith.mulf %147, %148 : vector<8x128xf32>
    %150 = vector.broadcast %129 : vector<1x128xf32> to vector<8x128xf32>
    %151 = arith.addf %149, %150 : vector<8x128xf32>
    %152 = arith.truncf %151 : vector<8x128xf32> to vector<8x128xbf16>
    %c1 = arith.constant 1 : index
    %c0_67 = arith.constant 0 : index
    %c0_68 = arith.constant 0 : index
    %153 = vector.load %arg4[%c1, %c0_67, %c0_68] : memref<2x128x384xbf16, #tpu.memory_space<vmem>>, vector<1x128x384xbf16>
    %154 = vector.shape_cast %153 : vector<1x128x384xbf16> to vector<128x384xbf16>
    %cst_69 = arith.constant dense<0.000000e+00> : vector<8x384xf32>
    %155 = tpu.matmul %152, %154, %cst_69 {dimension_numbers = #tpu.dot_dimension_numbers<[1], [0], [0], [1], [0, 0, 1, 1], [], []>} : vector<8x128xbf16>, vector<128x384xbf16>, vector<8x384xf32> -> vector<8x384xf32>
    %c1_70 = arith.constant 1 : index
    %c0_71 = arith.constant 0 : index
    %c0_72 = arith.constant 0 : index
    %156 = vector.load %arg5[%c1_70, %c0_71, %c0_72] : memref<2x1x384xf32, #tpu.memory_space<vmem>>, vector<1x1x384xf32>
    %157 = vector.shape_cast %156 : vector<1x1x384xf32> to vector<1x384xf32>
    %158 = vector.broadcast %157 : vector<1x384xf32> to vector<8x384xf32>
    %159 = arith.addf %155, %158 : vector<8x384xf32>
    %160 = vector.extract_strided_slice %159 {offsets = [0, 0], sizes = [8, 64], strides = [1, 1]} : vector<8x384xf32> to vector<8x64xf32>
    %161 = vector.shape_cast %160 : vector<8x64xf32> to vector<1x8x64xf32>
    %162 = vector.extract_strided_slice %159 {offsets = [0, 128], sizes = [8, 64], strides = [1, 1]} : vector<8x384xf32> to vector<8x64xf32>
    %163 = vector.shape_cast %162 : vector<8x64xf32> to vector<1x8x64xf32>
    %164 = vector.extract_strided_slice %159 {offsets = [0, 256], sizes = [8, 64], strides = [1, 1]} : vector<8x384xf32> to vector<8x64xf32>
    %165 = vector.shape_cast %164 : vector<8x64xf32> to vector<1x8x64xf32>
    %166 = arith.truncf %161 : vector<1x8x64xf32> to vector<1x8x64xbf16>
    %167 = arith.truncf %163 : vector<1x8x64xf32> to vector<1x8x64xbf16>
    "tpu.trace_start"() <{level = 10 : i32, message = "bld,bmd->blm"}> : () -> ()
    %cst_73 = arith.constant dense<0.000000e+00> : vector<1x8x8xf32>
    %168 = tpu.matmul %166, %167, %cst_73 {dimension_numbers = #tpu.dot_dimension_numbers<[2], [2], [1], [1], [0, 0, 0, 1, 1, 1], [0], [0]>} : vector<1x8x64xbf16>, vector<1x8x64xbf16>, vector<1x8x8xf32> -> vector<1x8x8xf32>
    "tpu.trace_stop"() : () -> ()
    %cst_74 = arith.constant 2.500000e-01 : f32
    %169 = vector.broadcast %cst_74 : f32 to vector<1x8x8xf32>
    %170 = arith.mulf %168, %169 : vector<1x8x8xf32>
    %171 = arith.addf %170, %9 : vector<1x8x8xf32>
    %cst_75 = arith.constant dense<0xFF800000> : vector<1x8xf32>
    %172 = vector.multi_reduction <maximumf>, %171, %cst_75 [2] : vector<1x8x8xf32> to vector<1x8xf32>
    %173 = vector.shape_cast %172 : vector<1x8xf32> to vector<1x8x1xf32>
    %174 = vector.broadcast %173 : vector<1x8x1xf32> to vector<1x8x8xf32>
    %175 = arith.subf %171, %174 : vector<1x8x8xf32>
    %176 = math.exp %175 : vector<1x8x8xf32>
    %cst_76 = arith.constant dense<0.000000e+00> : vector<1x8xf32>
    %177 = vector.multi_reduction <add>, %176, %cst_76 [2] : vector<1x8x8xf32> to vector<1x8xf32>
    %178 = vector.shape_cast %177 : vector<1x8xf32> to vector<1x8x1xf32>
    %179 = tpu.reciprocal %178 {approx = true} : vector<1x8x1xf32> -> vector<1x8x1xf32>
    %180 = vector.broadcast %179 : vector<1x8x1xf32> to vector<1x8x8xf32>
    %181 = arith.mulf %176, %180 : vector<1x8x8xf32>
    %182 = arith.truncf %181 : vector<1x8x8xf32> to vector<1x8x8xbf16>
    %183 = arith.truncf %165 : vector<1x8x64xf32> to vector<1x8x64xbf16>
    "tpu.trace_start"() <{level = 10 : i32, message = "blm,bmd->bld"}> : () -> ()
    %cst_77 = arith.constant dense<0.000000e+00> : vector<1x8x64xf32>
    %184 = tpu.matmul %182, %183, %cst_77 {dimension_numbers = #tpu.dot_dimension_numbers<[2], [1], [1], [2], [0, 0, 0, 1, 1, 2], [0], [0]>} : vector<1x8x8xbf16>, vector<1x8x64xbf16>, vector<1x8x64xf32> -> vector<1x8x64xf32>
    "tpu.trace_stop"() : () -> ()
    %185 = vector.extract_strided_slice %159 {offsets = [0, 64], sizes = [8, 64], strides = [1, 1]} : vector<8x384xf32> to vector<8x64xf32>
    %186 = vector.shape_cast %185 : vector<8x64xf32> to vector<1x8x64xf32>
    %187 = vector.extract_strided_slice %159 {offsets = [0, 192], sizes = [8, 64], strides = [1, 1]} : vector<8x384xf32> to vector<8x64xf32>
    %188 = vector.shape_cast %187 : vector<8x64xf32> to vector<1x8x64xf32>
    %189 = vector.extract_strided_slice %159 {offsets = [0, 320], sizes = [8, 64], strides = [1, 1]} : vector<8x384xf32> to vector<8x64xf32>
    %190 = vector.shape_cast %189 : vector<8x64xf32> to vector<1x8x64xf32>
    %191 = arith.truncf %186 : vector<1x8x64xf32> to vector<1x8x64xbf16>
    %192 = arith.truncf %188 : vector<1x8x64xf32> to vector<1x8x64xbf16>
    "tpu.trace_start"() <{level = 10 : i32, message = "bld,bmd->blm"}> : () -> ()
    %cst_78 = arith.constant dense<0.000000e+00> : vector<1x8x8xf32>
    %193 = tpu.matmul %191, %192, %cst_78 {dimension_numbers = #tpu.dot_dimension_numbers<[2], [2], [1], [1], [0, 0, 0, 1, 1, 1], [0], [0]>} : vector<1x8x64xbf16>, vector<1x8x64xbf16>, vector<1x8x8xf32> -> vector<1x8x8xf32>
    "tpu.trace_stop"() : () -> ()
    %cst_79 = arith.constant 2.500000e-01 : f32
    %194 = vector.broadcast %cst_79 : f32 to vector<1x8x8xf32>
    %195 = arith.mulf %193, %194 : vector<1x8x8xf32>
    %196 = arith.addf %195, %9 : vector<1x8x8xf32>
    %cst_80 = arith.constant dense<0xFF800000> : vector<1x8xf32>
    %197 = vector.multi_reduction <maximumf>, %196, %cst_80 [2] : vector<1x8x8xf32> to vector<1x8xf32>
    %198 = vector.shape_cast %197 : vector<1x8xf32> to vector<1x8x1xf32>
    %199 = vector.broadcast %198 : vector<1x8x1xf32> to vector<1x8x8xf32>
    %200 = arith.subf %196, %199 : vector<1x8x8xf32>
    %201 = math.exp %200 : vector<1x8x8xf32>
    %cst_81 = arith.constant dense<0.000000e+00> : vector<1x8xf32>
    %202 = vector.multi_reduction <add>, %201, %cst_81 [2] : vector<1x8x8xf32> to vector<1x8xf32>
    %203 = vector.shape_cast %202 : vector<1x8xf32> to vector<1x8x1xf32>
    %204 = tpu.reciprocal %203 {approx = true} : vector<1x8x1xf32> -> vector<1x8x1xf32>
    %205 = vector.broadcast %204 : vector<1x8x1xf32> to vector<1x8x8xf32>
    %206 = arith.mulf %201, %205 : vector<1x8x8xf32>
    %207 = arith.truncf %206 : vector<1x8x8xf32> to vector<1x8x8xbf16>
    %208 = arith.truncf %190 : vector<1x8x64xf32> to vector<1x8x64xbf16>
    "tpu.trace_start"() <{level = 10 : i32, message = "blm,bmd->bld"}> : () -> ()
    %cst_82 = arith.constant dense<0.000000e+00> : vector<1x8x64xf32>
    %209 = tpu.matmul %207, %208, %cst_82 {dimension_numbers = #tpu.dot_dimension_numbers<[2], [1], [1], [2], [0, 0, 0, 1, 1, 2], [0], [0]>} : vector<1x8x8xbf16>, vector<1x8x64xbf16>, vector<1x8x64xf32> -> vector<1x8x64xf32>
    "tpu.trace_stop"() : () -> ()
    %210 = tpu.concatenate %184, %209 in 2 : vector<1x8x64xf32>, vector<1x8x64xf32> -> vector<1x8x128xf32>
    %211 = vector.shape_cast %210 : vector<1x8x128xf32> to vector<8x128xf32>
    %212 = arith.truncf %211 : vector<8x128xf32> to vector<8x128xbf16>
    %c1_83 = arith.constant 1 : index
    %c0_84 = arith.constant 0 : index
    %c0_85 = arith.constant 0 : index
    %213 = vector.load %arg6[%c1_83, %c0_84, %c0_85] : memref<2x128x128xbf16, #tpu.memory_space<vmem>>, vector<1x128x128xbf16>
    %214 = vector.shape_cast %213 : vector<1x128x128xbf16> to vector<128x128xbf16>
    %cst_86 = arith.constant dense<0.000000e+00> : vector<8x128xf32>
    %215 = tpu.matmul %212, %214, %cst_86 {dimension_numbers = #tpu.dot_dimension_numbers<[1], [0], [0], [1], [0, 0, 1, 1], [], []>} : vector<8x128xbf16>, vector<128x128xbf16>, vector<8x128xf32> -> vector<8x128xf32>
    %c1_87 = arith.constant 1 : index
    %c0_88 = arith.constant 0 : index
    %c0_89 = arith.constant 0 : index
    %216 = vector.load %arg7[%c1_87, %c0_88, %c0_89] : memref<2x1x128xf32, #tpu.memory_space<vmem>>, vector<1x1x128xf32>
    %217 = vector.shape_cast %216 : vector<1x1x128xf32> to vector<1x128xf32>
    %218 = vector.broadcast %217 : vector<1x128xf32> to vector<8x128xf32>
    %219 = arith.addf %215, %218 : vector<8x128xf32>
    %220 = arith.addf %151, %219 : vector<8x128xf32>
    %c1_90 = arith.constant 1 : index
    %c0_91 = arith.constant 0 : index
    %c0_92 = arith.constant 0 : index
    %221 = vector.load %arg8[%c1_90, %c0_91, %c0_92] : memref<2x1x128xf32, #tpu.memory_space<vmem>>, vector<1x1x128xf32>
    %222 = vector.shape_cast %221 : vector<1x1x128xf32> to vector<1x128xf32>
    %c1_93 = arith.constant 1 : index
    %c0_94 = arith.constant 0 : index
    %c0_95 = arith.constant 0 : index
    %223 = vector.load %arg9[%c1_93, %c0_94, %c0_95] : memref<2x1x128xf32, #tpu.memory_space<vmem>>, vector<1x1x128xf32>
    %224 = vector.shape_cast %223 : vector<1x1x128xf32> to vector<1x128xf32>
    %cst_96 = arith.constant dense<0.000000e+00> : vector<8xf32>
    %225 = vector.multi_reduction <add>, %220, %cst_96 [1] : vector<8x128xf32> to vector<8xf32>
    %226 = vector.shape_cast %225 : vector<8xf32> to vector<8x1xf32>
    %cst_97 = arith.constant 3.125000e-02 : f32
    %227 = vector.broadcast %cst_97 : f32 to vector<8x1xf32>
    %228 = arith.mulf %226, %227 : vector<8x1xf32>
    %229 = arith.mulf %220, %220 : vector<8x128xf32>
    %cst_98 = arith.constant dense<0.000000e+00> : vector<8xf32>
    %230 = vector.multi_reduction <add>, %229, %cst_98 [1] : vector<8x128xf32> to vector<8xf32>
    %231 = vector.shape_cast %230 : vector<8xf32> to vector<8x1xf32>
    %cst_99 = arith.constant 3.125000e-02 : f32
    %232 = vector.broadcast %cst_99 : f32 to vector<8x1xf32>
    %233 = arith.mulf %231, %232 : vector<8x1xf32>
    %234 = arith.mulf %228, %228 : vector<8x1xf32>
    %235 = arith.subf %233, %234 : vector<8x1xf32>
    %236 = vector.broadcast %228 : vector<8x1xf32> to vector<8x128xf32>
    %237 = arith.subf %220, %236 : vector<8x128xf32>
    %cst_100 = arith.constant 9.99999974E-6 : f32
    %238 = vector.broadcast %cst_100 : f32 to vector<8x1xf32>
    %239 = arith.addf %235, %238 : vector<8x1xf32>
    %240 = math.rsqrt %239 : vector<8x1xf32>
    %241 = vector.broadcast %240 : vector<8x1xf32> to vector<8x128xf32>
    %242 = arith.mulf %237, %241 : vector<8x128xf32>
    %243 = vector.broadcast %222 : vector<1x128xf32> to vector<8x128xf32>
    %244 = arith.mulf %242, %243 : vector<8x128xf32>
    %245 = vector.broadcast %224 : vector<1x128xf32> to vector<8x128xf32>
    %246 = arith.addf %244, %245 : vector<8x128xf32>
    %247 = arith.truncf %246 : vector<8x128xf32> to vector<8x128xbf16>
    %c1_101 = arith.constant 1 : index
    %c0_102 = arith.constant 0 : index
    %c0_103 = arith.constant 0 : index
    %248 = vector.load %arg10[%c1_101, %c0_102, %c0_103] : memref<2x128x128xbf16, #tpu.memory_space<vmem>>, vector<1x128x128xbf16>
    %249 = vector.shape_cast %248 : vector<1x128x128xbf16> to vector<128x128xbf16>
    %cst_104 = arith.constant dense<0.000000e+00> : vector<8x128xf32>
    %250 = tpu.matmul %247, %249, %cst_104 {dimension_numbers = #tpu.dot_dimension_numbers<[1], [0], [0], [1], [0, 0, 1, 1], [], []>} : vector<8x128xbf16>, vector<128x128xbf16>, vector<8x128xf32> -> vector<8x128xf32>
    %c1_105 = arith.constant 1 : index
    %c0_106 = arith.constant 0 : index
    %c0_107 = arith.constant 0 : index
    %251 = vector.load %arg11[%c1_105, %c0_106, %c0_107] : memref<2x1x128xf32, #tpu.memory_space<vmem>>, vector<1x1x128xf32>
    %252 = vector.shape_cast %251 : vector<1x1x128xf32> to vector<1x128xf32>
    %253 = vector.broadcast %252 : vector<1x128xf32> to vector<8x128xf32>
    %254 = arith.addf %250, %253 : vector<8x128xf32>
    %cst_108 = arith.constant 0.000000e+00 : f32
    %255 = vector.broadcast %cst_108 : f32 to vector<8x128xf32>
    %256 = arith.maximumf %254, %255 : vector<8x128xf32>
    %257 = arith.truncf %256 : vector<8x128xf32> to vector<8x128xbf16>
    %c1_109 = arith.constant 1 : index
    %c0_110 = arith.constant 0 : index
    %c0_111 = arith.constant 0 : index
    %258 = vector.load %arg12[%c1_109, %c0_110, %c0_111] : memref<2x128x128xbf16, #tpu.memory_space<vmem>>, vector<1x128x128xbf16>
    %259 = vector.shape_cast %258 : vector<1x128x128xbf16> to vector<128x128xbf16>
    %cst_112 = arith.constant dense<0.000000e+00> : vector<8x128xf32>
    %260 = tpu.matmul %257, %259, %cst_112 {dimension_numbers = #tpu.dot_dimension_numbers<[1], [0], [0], [1], [0, 0, 1, 1], [], []>} : vector<8x128xbf16>, vector<128x128xbf16>, vector<8x128xf32> -> vector<8x128xf32>
    %c1_113 = arith.constant 1 : index
    %c0_114 = arith.constant 0 : index
    %c0_115 = arith.constant 0 : index
    %261 = vector.load %arg13[%c1_113, %c0_114, %c0_115] : memref<2x1x128xf32, #tpu.memory_space<vmem>>, vector<1x1x128xf32>
    %262 = vector.shape_cast %261 : vector<1x1x128xf32> to vector<1x128xf32>
    %263 = vector.broadcast %262 : vector<1x128xf32> to vector<8x128xf32>
    %264 = arith.addf %260, %263 : vector<8x128xf32>
    %265 = arith.addf %246, %264 : vector<8x128xf32>
    %c1_116 = arith.constant 1 : index
    %c0_117 = arith.constant 0 : index
    %c0_118 = arith.constant 0 : index
    %266 = vector.load %arg14[%c1_116, %c0_117, %c0_118] : memref<2x1x128xf32, #tpu.memory_space<vmem>>, vector<1x1x128xf32>
    %267 = vector.shape_cast %266 : vector<1x1x128xf32> to vector<1x128xf32>
    %c1_119 = arith.constant 1 : index
    %c0_120 = arith.constant 0 : index
    %c0_121 = arith.constant 0 : index
    %268 = vector.load %arg15[%c1_119, %c0_120, %c0_121] : memref<2x1x128xf32, #tpu.memory_space<vmem>>, vector<1x1x128xf32>
    %269 = vector.shape_cast %268 : vector<1x1x128xf32> to vector<1x128xf32>
    %cst_122 = arith.constant dense<0.000000e+00> : vector<8xf32>
    %270 = vector.multi_reduction <add>, %265, %cst_122 [1] : vector<8x128xf32> to vector<8xf32>
    %271 = vector.shape_cast %270 : vector<8xf32> to vector<8x1xf32>
    %cst_123 = arith.constant 3.125000e-02 : f32
    %272 = vector.broadcast %cst_123 : f32 to vector<8x1xf32>
    %273 = arith.mulf %271, %272 : vector<8x1xf32>
    %274 = arith.mulf %265, %265 : vector<8x128xf32>
    %cst_124 = arith.constant dense<0.000000e+00> : vector<8xf32>
    %275 = vector.multi_reduction <add>, %274, %cst_124 [1] : vector<8x128xf32> to vector<8xf32>
    %276 = vector.shape_cast %275 : vector<8xf32> to vector<8x1xf32>
    %cst_125 = arith.constant 3.125000e-02 : f32
    %277 = vector.broadcast %cst_125 : f32 to vector<8x1xf32>
    %278 = arith.mulf %276, %277 : vector<8x1xf32>
    %279 = arith.mulf %273, %273 : vector<8x1xf32>
    %280 = arith.subf %278, %279 : vector<8x1xf32>
    %281 = vector.broadcast %273 : vector<8x1xf32> to vector<8x128xf32>
    %282 = arith.subf %265, %281 : vector<8x128xf32>
    %cst_126 = arith.constant 9.99999974E-6 : f32
    %283 = vector.broadcast %cst_126 : f32 to vector<8x1xf32>
    %284 = arith.addf %280, %283 : vector<8x1xf32>
    %285 = math.rsqrt %284 : vector<8x1xf32>
    %286 = vector.broadcast %285 : vector<8x1xf32> to vector<8x128xf32>
    %287 = arith.mulf %282, %286 : vector<8x128xf32>
    %288 = vector.broadcast %267 : vector<1x128xf32> to vector<8x128xf32>
    %289 = arith.mulf %287, %288 : vector<8x128xf32>
    %290 = vector.broadcast %269 : vector<1x128xf32> to vector<8x128xf32>
    %291 = arith.addf %289, %290 : vector<8x128xf32>
    %292 = vector.shape_cast %291 : vector<8x128xf32> to vector<1x8x128xf32>
    %293 = vector.shape_cast %292 : vector<1x8x128xf32> to vector<1x1x8x128xf32>
    %c0_127 = arith.constant 0 : index
    %c0_128 = arith.constant 0 : index
    %c0_129 = arith.constant 0 : index
    %c0_130 = arith.constant 0 : index
    %294 = vector.load %arg3[%c0_127, %c0_128, %c0_129, %c0_130] : memref<1x2x8x128xf32, #tpu.memory_space<vmem>>, vector<1x2x8x128xf32>
    %295 = vector.broadcast %293 : vector<1x1x8x128xf32> to vector<1x2x8x128xf32>
    %296 = arith.mulf %295, %294 : vector<1x2x8x128xf32>
    %cst_131 = arith.constant dense<0.000000e+00> : vector<1x2x8xf32>
    %297 = vector.multi_reduction <add>, %296, %cst_131 [3] : vector<1x2x8x128xf32> to vector<1x2x8xf32>
    %c0_132 = arith.constant 0 : index
    %c0_133 = arith.constant 0 : index
    %c0_134 = arith.constant 0 : index
    %298 = vector.load %arg16[%c0_132, %c0_133, %c0_134] : memref<1x2x8xf32, #tpu.memory_space<vmem>>, vector<1x2x8xf32>
    tpu.vector_store %arg16[%c0_132, %c0_133, %c0_134], %297 {strides = array<i32>} : memref<1x2x8xf32, #tpu.memory_space<vmem>>, vector<1x2x8xf32>,
    return
  }
  func.func @transform_0(%arg0: i32) -> (i32, i32, i32) {
    %c0_i32 = arith.constant 0 : i32
    %c0_i32_0 = arith.constant 0 : i32
    %c0_i32_1 = arith.constant 0 : i32
    return %arg0, %c0_i32, %c0_i32_0 : i32, i32, i32
  }
  func.func @transform_1(%arg0: i32) -> (i32, i32, i32) {
    %c0_i32 = arith.constant 0 : i32
    %c0_i32_0 = arith.constant 0 : i32
    %c0_i32_1 = arith.constant 0 : i32
    return %arg0, %c0_i32, %c0_i32_0 : i32, i32, i32
  }
  func.func @transform_2(%arg0: i32) -> (i32, i32, i32, i32) {
    %c0_i32 = arith.constant 0 : i32
    %c0_i32_0 = arith.constant 0 : i32
    %c0_i32_1 = arith.constant 0 : i32
    %c0_i32_2 = arith.constant 0 : i32
    return %arg0, %c0_i32, %c0_i32_0, %c0_i32_1 : i32, i32, i32, i32
  }
  func.func @transform_3(%arg0: i32) -> (i32, i32, i32) {
    %c0_i32 = arith.constant 0 : i32
    %c0_i32_0 = arith.constant 0 : i32
    %c0_i32_1 = arith.constant 0 : i32
    %c0_i32_2 = arith.constant 0 : i32
    return %c0_i32, %c0_i32_0, %c0_i32_1 : i32, i32, i32
  }
  func.func @transform_4(%arg0: i32) -> (i32, i32, i32) {
    %c0_i32 = arith.constant 0 : i32
    %c0_i32_0 = arith.constant 0 : i32
    %c0_i32_1 = arith.constant 0 : i32
    %c0_i32_2 = arith.constant 0 : i32
    return %c0_i32, %c0_i32_0, %c0_i32_1 : i32, i32, i32
  }
  func.func @transform_5(%arg0: i32) -> (i32, i32, i32) {
    %c0_i32 = arith.constant 0 : i32
    %c0_i32_0 = arith.constant 0 : i32
    %c0_i32_1 = arith.constant 0 : i32
    %c0_i32_2 = arith.constant 0 : i32
    return %c0_i32, %c0_i32_0, %c0_i32_1 : i32, i32, i32
  }
  func.func @transform_6(%arg0: i32) -> (i32, i32, i32) {
    %c0_i32 = arith.constant 0 : i32
    %c0_i32_0 = arith.constant 0 : i32
    %c0_i32_1 = arith.constant 0 : i32
    %c0_i32_2 = arith.constant 0 : i32
    return %c0_i32, %c0_i32_0, %c0_i32_1 : i32, i32, i32
  }
  func.func @transform_7(%arg0: i32) -> (i32, i32, i32) {
    %c0_i32 = arith.constant 0 : i32
    %c0_i32_0 = arith.constant 0 : i32
    %c0_i32_1 = arith.constant 0 : i32
    %c0_i32_2 = arith.constant 0 : i32
    return %c0_i32, %c0_i32_0, %c0_i32_1 : i32, i32, i32
  }
  func.func @transform_8(%arg0: i32) -> (i32, i32, i32) {
    %c0_i32 = arith.constant 0 : i32
    %c0_i32_0 = arith.constant 0 : i32
    %c0_i32_1 = arith.constant 0 : i32
    %c0_i32_2 = arith.constant 0 : i32
    return %c0_i32, %c0_i32_0, %c0_i32_1 : i32, i32, i32
  }
  func.func @transform_9(%arg0: i32) -> (i32, i32, i32) {
    %c0_i32 = arith.constant 0 : i32
    %c0_i32_0 = arith.constant 0 : i32
    %c0_i32_1 = arith.constant 0 : i32
    %c0_i32_2 = arith.constant 0 : i32
    return %c0_i32, %c0_i32_0, %c0_i32_1 : i32, i32, i32
  }
  func.func @transform_10(%arg0: i32) -> (i32, i32, i32) {
    %c0_i32 = arith.constant 0 : i32
    %c0_i32_0 = arith.constant 0 : i32
    %c0_i32_1 = arith.constant 0 : i32
    %c0_i32_2 = arith.constant 0 : i32
    return %c0_i32, %c0_i32_0, %c0_i32_1 : i32, i32, i32
  }
  func.func @transform_11(%arg0: i32) -> (i32, i32, i32) {
    %c0_i32 = arith.constant 0 : i32
    %c0_i32_0 = arith.constant 0 : i32
    %c0_i32_1 = arith.constant 0 : i32
    %c0_i32_2 = arith.constant 0 : i32
    return %c0_i32, %c0_i32_0, %c0_i32_1 : i32, i32, i32
  }
  func.func @transform_12(%arg0: i32) -> (i32, i32, i32) {
    %c0_i32 = arith.constant 0 : i32
    %c0_i32_0 = arith.constant 0 : i32
    %c0_i32_1 = arith.constant 0 : i32
    %c0_i32_2 = arith.constant 0 : i32
    return %c0_i32, %c0_i32_0, %c0_i32_1 : i32, i32, i32
  }
  func.func @transform_13(%arg0: i32) -> (i32, i32, i32) {
    %c0_i32 = arith.constant 0 : i32
    %c0_i32_0 = arith.constant 0 : i32
    %c0_i32_1 = arith.constant 0 : i32
    %c0_i32_2 = arith.constant 0 : i32
    return %c0_i32, %c0_i32_0, %c0_i32_1 : i32, i32, i32
  }
  func.func @transform_14(%arg0: i32) -> (i32, i32, i32) {
    %c0_i32 = arith.constant 0 : i32
    %c0_i32_0 = arith.constant 0 : i32
    %c0_i32_1 = arith.constant 0 : i32
    %c0_i32_2 = arith.constant 0 : i32
    return %c0_i32, %c0_i32_0, %c0_i32_1 : i32, i32, i32
  }
  func.func @transform_15(%arg0: i32) -> (i32, i32, i32) {
    %c0_i32 = arith.constant 0 : i32
    %c0_i32_0 = arith.constant 0 : i32
    %c0_i32_1 = arith.constant 0 : i32
    return %arg0, %c0_i32, %c0_i32_0 : i32, i32, i32
  }
}

</mosaic_0001>

<bundles_post_ra>
// kernel: sasrec_forward.1
= control target key start
LH: loop header
LB: loop body
LE: loop exit
PB: predicated region body
PF: predicated region fallthrough
CT: control target
= control target key end

     0   :  { %20 = vsyncpa [#allocation3], 0  ;;  %s3240_s18 = smov 0   ;;  %s3781_s0 = inlined_call_operand.vmem [shape: f32[2,8,128], index: 0, kind: input, shape index: {}]   ;;  %s3782_s1 = inlined_call_operand.vmem [shape: f32[2,1,8], index: 1, kind: input, shape index: {}]   ;;  %s3783_s2 = inlined_call_operand.vmem [shape: f32[2,2,8,128], index: 2, kind: input, shape index: {}]   ;;  %s3784_s3 = inlined_call_operand.vmem [shape: bf16[2,128,384], index: 3, kind: input, shape index: {}]   ;;  %s3785_s4 = inlined_call_operand.vmem [shape: f32[2,1,384], index: 4, kind: input, shape index: {}]   ;;  %s3786_s5 = inlined_call_operand.vmem [shape: bf16[2,128,128], index: 5, kind: input, shape index: {}]   ;;  %s3787_s6 = inlined_call_operand.vmem [shape: f32[2,1,128], index: 6, kind: input, shape index: {}]   ;;  %s3788_s7 = inlined_call_operand.vmem [shape: f32[2,1,128], index: 7, kind: input, shape index: {}]   ;;  %s3789_s8 = inlined_call_operand.vmem [shape: f32[2,1,128], index: 8, kind: input, shape index: {}]   ;;  %s3790_s9 = inlined_call_operand.vmem [shape: bf16[2,128,128], index: 9, kind: input, shape index: {}]   ;;  %s3791_s10 = inlined_call_operand.vmem [shape: f32[2,1,128], index: 10, kind: input, shape index: {}]   ;;  %s3792_s11 = inlined_call_operand.hbm [shape: bf16[2,128,128], index: 11, kind: input, shape index: {}]   ;;  %s3793_s12 = inlined_call_operand.vmem [shape: f32[2,1,128], index: 12, kind: input, shape index: {}]   ;;  %s3794_s13 = inlined_call_operand.vmem [shape: f32[2,1,128], index: 13, kind: input, shape index: {}]   ;;  %s3795_s14 = inlined_call_operand.vmem [shape: f32[2,1,128], index: 14, kind: input, shape index: {}]   ;;  %s3796_s15 = inlined_call_operand.vmem [shape: f32[2,2,8], index: 15, kind: output, shape index: {}]  }
   0x1 LB: > { %s3246_s19 = sadd.s32 4294967295, %s3150_s18   ;;  %p2451_p0 = scmp.ge.s32.totalorder %s3150_s18, 1  ;;  %s3150_s18 = sphi %s3240_s18, %s26_s18  }
   0x2   : > { %p387_p1 = scmp.lt.s32.totalorder %s3150_s18, 3  ;;  %s3152_s20 = smov [#allocation2]  }
   0x3   : > { %s423_s21 = sshll.u32 %s3152_s20, 4  ;;  %p3797_p3 = scmp.eq.s32.totalorder %s3246_s19, 0  ;;  %s424_s21 = int_to_ptr.vmem [resolvable:$true] %s423_s21 }
   0x4   : > { %p3250_p2 = pnand %p2451_p0, %p387_p1  ;;  %s3112_s26 = scalar_lea.hbm %s3792_s11, 2048 }
   0x5   : > { %p3113_p6 = scmp.ne.s32.totalorder %s3792_s11, %s3112_s26  ;;  %p3119_p10 = scmp.lt.u32.totalorder %s3112_s26, %s3792_s11 }
   0x6   : > { %s3799_s22 = scalar_select %p3250_p2, 1, 0 }
   0x7   : > { %p2954_p4 = pneg %p3250_p2 }
   0x9   : > { %p3259_p5 = pnand %p3797_p3, %p2954_p4 }
   0xb   : > { %p3114_p7 = pneg %p3259_p5 }
   0xd   : > { %p3115_p8 = pnand %p3114_p7, %p3113_p6 }
   0xf   : > { %p3116_p9 = pneg %p3115_p8 }
  0x11   : > { %p3121_p11 = pnand %p3119_p10, %p3116_p9 }
  0x13   : > { %3124 = shalt.err (!%p3121_p11)
}
  0x14   : > { %s3125_s16 = scalar_lea.vmem %s424_s21, 2048  ;;  %p3133_p1 = scmp.lt.s32.totalorder %s424_s21, %s424_s21 }
  0x15   : > { %p3126_p12 = scmp.ne.s32.totalorder %s424_s21, %s3125_s16  ;;  %p3134_p4 = scmp.lt.s32.totalorder %s3125_s16, %s3125_s16 }
  0x17   : > { %p3128_p13 = pnand %p3126_p12, %p3114_p7  ;;  %p3135_p3 = por %p3134_p4, %p3133_p1 }
  0x19   : > { %p3129_p0 = pneg %p3128_p13 }
  0x1b   : > { %p3136_p2 = pnand %p3135_p3, %p3129_p0 }
  0x1d   : > { %3139 = shalt.err (!%p3136_p2)
}
  0x1e   : > { %s3153_s17 = smov 64   ;;  %s3154_s20 = smov 4  }
  0x1f   : > { %2957 = dma.hbm_to_vmem [thread:$0]  (!%p3259_p5), %s3792_s11, 2048, %s424_s21, [#allocation3], %s3153_s17, %s3153_s17, %s3154_s20  }
  0x20   : > { %p3801_p6 = scmp.ne.s32.totalorder %s3799_s22, 0 }
  0x21   : > { %p3802_p8 = scmp.eq.s32.totalorder (!%p3801_p6), %s3246_s19, 0 }
  0x22   : > { %469 = sbr.rel (%p3801_p6) target bundleno = 5456 (0x1550), region = 80 }
  0x29   : > { %3145 = dma.done.wait (%p3802_p8), [#allocation3], 2048   ;;  %p3803_p7 = pmov %p3802_p8 }
  0x2a   : > { %v3155_v0 = vmov 0   ;;  %v3156_v1 = vmov 0.0   ;;  %v2976_v2 = vld [vmem:[%s3784_s3 + $0x4] ss:$12 sps:$4 sm:$0xff]   ;;  %v2978_v3 = vld [vmem:[%s3784_s3] ss:$12 sps:$4 sm:$0xff]   ;;  %v540_v28 = vlaneseq }
  0x2b   : > { %3147 = vsyncadd (%p3803_p7), [#allocation3], 4294965248  ;;  %765 = vmatprep.mubr.bf16.mxu0 %v3155_v0  ;;  %2742 = vmatprep.subr.bf16.mxu1 %v3156_v1  ;;  %v2979_v4 = vld [vmem:[%s3784_s3 + $0x1c] ss:$12 sps:$4 sm:$0xff]   ;;  %v2981_v5 = vld [vmem:[%s3784_s3 + $0x18] ss:$12 sps:$4 sm:$0xff]  }
  0x2c   : > { %733 = vmatprep.subr.bf16.mxu0 %v2976_v2  ;;  %v2982_v6 = vld [vmem:[%s3784_s3 + $0x34] ss:$12 sps:$4 sm:$0xff]   ;;  %p523_p2 = scmp.lt.s32.totalorder %s3246_s19, 1  ;;  %v2984_v7 = vld [vmem:[%s3784_s3 + $0x30] ss:$12 sps:$4 sm:$0xff]   ;;  %vm3157_vm0 = vmmov 0  }
  0x2d   : > { %734 = vmatpush1.bf16.msra.mxu0 %v2978_v3  ;;  %v2985_v8 = vld [vmem:[%s3784_s3 + $0x4c] ss:$12 sps:$4 sm:$0xff]   ;;  %v2987_v9 = vld [vmem:[%s3784_s3 + $0x48] ss:$12 sps:$4 sm:$0xff]   ;;  %v2988_v11 = vld [vmem:[%s3784_s3 + $0x64] ss:$12 sps:$4 sm:$0xff]   ;;  %2758 = vmatprep.mubr.msk.bf16.mxu1 %vm3157_vm0, %v3156_v1 }
  0x2e   : > { %735 = vmatprep.subr.bf16.mxu0 %v2979_v4  ;;  %s3805_s19 = smov (!%p523_p2, %s3246_s19), 1  ;;  %v3000_v10 = vld [vmem:[%s3784_s3 + $0x8] ss:$12 sps:$4 sm:$0xff]   ;;  %v3001_v12 = vld [vmem:[%s3784_s3 + $0x20] ss:$12 sps:$4 sm:$0xff]   ;;  %v3386_v29 = vshrl.u32 %v540_v28, 7 }
  0x2f   : > { %2743 = vmatpush3.bf16.msra.mxu1 %v3000_v10  ;;  %s2456_s17 = sshll.u32 %s3805_s19, 3  ;;  %v2990_v13 = vld [vmem:[%s3784_s3 + $0x60] ss:$12 sps:$4 sm:$0xff]   ;;  %v2991_v14 = vld [vmem:[%s3784_s3 + $0x7c] ss:$12 sps:$4 sm:$0xff]   ;;  %vm816_vm1 = vcmask 523264   ;;  %s529_s29 = scalar_lea.vmem %s3782_s1, %s3805_s19 }
  0x30   : > { %2744 = vmatprep.subr.bf16.mxu1 %v3156_v1  ;;  %v2993_v15 = vld [vmem:[%s3784_s3 + $0x78] ss:$12 sps:$4 sm:$0xff]   ;;  %v2994_v17 = vld [vmem:[%s3784_s3 + $0x94] ss:$12 sps:$4 sm:$0xff]   ;;  %v3003_v18 = vld [vmem:[%s3784_s3 + $0x50] ss:$12 sps:$4 sm:$0xff]   ;;  %s526_s22 = scalar_lea.vmem %s3781_s0, %s2456_s17 }
  0x31   : > { %736 = vmatpush1.bf16.msra.mxu0 %v2981_v5  ;;  %v3002_v16 = vld [vmem:[%s3784_s3 + $0x38] ss:$12 sps:$4 sm:$0xff]   ;;  %v2996_v19 = vld [vmem:[%s3784_s3 + $0x90] ss:$12 sps:$4 sm:$0xff]   ;;  %v3004_v21 = vld [vmem:[%s3784_s3 + $0x68] ss:$12 sps:$4 sm:$0xff]  }
  0x32   : > { %737 = vmatprep.subr.bf16.mxu0 %v2982_v6  ;;  %v2997_v20 = vld [vmem:[%s3784_s3 + $0xac] ss:$12 sps:$4 sm:$0xff]   ;;  %v2999_v22 = vld [vmem:[%s3784_s3 + $0xa8] ss:$12 sps:$4 sm:$0xff]   ;;  %v3361_v23 = vld [vmem:[%s526_s22] sm:$0xff]  ;;  %v596_v30 = vsub.s32 1, %v3386_v29 }
  0x33   : > { %2745 = vmatpush3.bf16.msra.mxu1 %v3001_v12  ;;  %v3005_v24 = vld [vmem:[%s3784_s3 + $0x80] ss:$12 sps:$4 sm:$0xff]   ;;  %v555_v25 = vpack.c.bf16 %v3361_v23, %v3361_v23  ;;  %v3006_v26 = vld [vmem:[%s3784_s3 + $0x98] ss:$12 sps:$4 sm:$0xff]   ;;  %v3007_v27 = vld [vmem:[%s3784_s3 + $0xb0] ss:$12 sps:$4 sm:$0xff]  }
  0x34   : > { %2746 = vmatprep.subr.bf16.mxu1 %v3156_v1  ;;  %v588_v31 = vld [vmem:[%s3785_s4] sm:$0x7]  ;;  %v592_v32 = vsub.s32 0, %v3386_v29  ;;  %s3158_s22 = smov 64   ;;  %v600_v44 = vsub.s32 2, %v3386_v29  ;;  %vm882_vm2 = vcmask 1043456  }
  0x35   : > { %738 = vmatpush1.bf16.msra.mxu0 %v2984_v7  ;;  %v597_v33 = vrot.slane %v588_v31, %v596_v30  ;;  %v3409_v53 = vand.u32 127, %v540_v28  ;;  %v3159_v54 = vmov -1e+09   ;;  %v2460_v56 = vld [vmem:[%s529_s29] ss:$0 sm:$0xff]  ;;  %vm865_vm4 = vcmask 64512  }
  0x36   : > { %739 = vmatprep.subr.bf16.mxu0 %v2985_v8  ;;  %v593_v34 = vrot.slane %v588_v31, %v592_v32  ;;  %v601_v45 = vrot.slane %v588_v31, %v600_v44  ;;  %s2653_s24 = sshll.u32 %s3805_s19, 4  ;;  %s2459_s29 = sshll.u32 %s3805_s19, 1  ;;  %vm2358_vm5 = vcmask 1041409   ;;  %vm2361_vm6 = vcmask 58368  }
  0x37   : > { %2747 = vmatpush3.bf16.msra.mxu1 %v3002_v16  ;;  %vm544_vm3 = vcmp.le.s32.totalorder %v3409_v53, %v3386_v29  ;;  %s534_s21 = scalar_lea.vmem %s3783_s2, %s2653_s24  ;;  %s538_s17 = scalar_lea.vmem %s3796_s15, %s2459_s29 }
  0x38   : > { %2748 = vmatprep.subr.bf16.mxu1 %v3156_v1  ;;  %v545_v55 = vsel %vm544_vm3, 0.0, %v3159_v54 }
  0x39   : > { %740 = vmatpush1.bf16.msra.mxu0 %v2987_v9  ;;  %v3417_v57 = vadd.f32 %v2460_v56, %v545_v55 }
  0x3a   : > { %741 = vmatprep.subr.bf16.mxu0 %v2988_v11 }
  0x3b   : > { %2749 = vmatpush3.bf16.msra.mxu1 %v3003_v18 }
  0x3c   : > { %2750 = vmatprep.subr.bf16.mxu1 %v3156_v1 }
  0x3d   : > { %742 = vmatpush1.bf16.msra.mxu0 %v2990_v13 }
  0x3e   : > { %743 = vmatprep.subr.bf16.mxu0 %v2991_v14 }
  0x3f   : > { %2751 = vmatpush3.bf16.msra.mxu1 %v3004_v21 }
  0x40   : > { %2752 = vmatprep.subr.bf16.mxu1 %v3156_v1 }
  0x41   : > { %744 = vmatpush1.bf16.msra.mxu0 %v2993_v15 }
  0x42   : > { %745 = vmatprep.subr.bf16.mxu0 %v2994_v17 }
  0x43   : > { %2753 = vmatpush3.bf16.msra.mxu1 %v3005_v24 }
  0x44   : > { %2754 = vmatprep.subr.bf16.mxu1 %v3156_v1 }
  0x45   : > { %746 = vmatpush1.bf16.msra.mxu0 %v2996_v19 }
  0x46   : > { %747 = vmatprep.subr.bf16.mxu0 %v2997_v20 }
  0x47   : > { %2755 = vmatpush3.bf16.msra.mxu1 %v3006_v26 }
  0x48   : > { %2756 = vmatprep.subr.bf16.mxu1 %v3156_v1 }
  0x49   : > { %748 = vmatpush1.bf16.msra.mxu0 %v2999_v22 }
  0x4a   : > { %2786 = vmatprep.subr.bf16.mxu0 %v3156_v1 }
  0x4b   : > { %2757 = vmatpush3.bf16.msra.mxu1 %v3007_v27 }
  0x4c   : > { %766 = vmatmul.mubr.bf16.vlgmr.msra.gmra.mrb[0].mxu0 %v555_v25  ;;  %2762 = vmatprep.subr.bf16.mxu1 %v3156_v1 }
  0x4d   : > { %2802 = vmatprep.mubr.msk.bf16.mxu0 %vm3157_vm0, %v3156_v1 }
  0x4e   : > { %2759 = vmatmul.mubr.bf16.vlgmr.msra.gmra.mrb[0].mxu1 %v555_v25 }
  0x4f   : > { %2764 = vmatprep.mubr.msk.bf16.mxu1 %vm3157_vm0, %v3156_v1 }
 0x11f   : > { %v767_v35 = vpop.f32.mrb[0].mxu0 }
 0x120   : > { %v769_v36 = vpop.f32.mrb[1].mxu0  ;;  %v768_v40 = vadd.f32 %v767_v35, %v593_v34 }
 0x121   : > { %v770_v37 = vadd.f32 %v769_v36, %v597_v33  ;;  %v771_v38 = vpop.f32.mrb[2].mxu0  ;;  %v808_v46 = vpop.f32.mrb[0].mxu1 }
 0x122   : > { %v772_v39 = vpop.f32.mrb[3].mxu0  ;;  %v814_v43 = vpack.c.bf16 %v768_v40, %v768_v40  ;;  %v809_v47 = vadd.f32 %v808_v46, %v601_v45  ;;  %v2760_v48 = vpop.f32.mrb[1].mxu1  ;;  %v3011_v45 = vld [vmem:[%s3786_s5 + $0x18] sm:$0xff]   ;;  %v3012_v46 = vld [vmem:[%s3786_s5 + $0x20] sm:$0xff]  }
 0x123   : > { %v815_v41 = vpack.c.bf16 %v770_v37, %v770_v37  ;;  %v811_v49 = vpop.f32.mrb[2].mxu1  ;;  %v3014_v48 = vld [vmem:[%s3786_s5 + $0x30] sm:$0xff]  }
 0x124   : > { %v878_v50 = vpack.c.bf16 %v809_v47, %v809_v47  ;;  %v2761_v51 = vpop.f32.mrb[3].mxu1  ;;  %v3013_v47 = vld [vmem:[%s3786_s5 + $0x28] sm:$0xff]   ;;  %v3015_v49 = vld [vmem:[%s3786_s5 + $0x38] sm:$0xff]  }
 0x125   : > { %v821_v42 = vsel %vm816_vm1, %v815_v41, 0  ;;  %930 = vrot.lane.b32.xlu1 %v815_v41, %s3158_s22  ;;  %v3008_v41 = vld [vmem:[%s3786_s5] sm:$0xff]  }
 0x126   : > { %2763 = vmatpush3.bf16.xpose.msra.mxu1 %v821_v42  ;;  %v884_v52 = vsel %vm882_vm2, %v878_v50, 0  ;;  %2787 = vmatpush3.bf16.msra.mxu0 %v3008_v41  ;;  %v3009_v42 = vld [vmem:[%s3786_s5 + $0x8] sm:$0xff]  }
 0x127   : > { %2768 = vmatprep.subr.bf16.mxu1 %v3156_v1  ;;  %2788 = vmatprep.subr.bf16.mxu0 %v3156_v1 }
 0x129   : > { %927 = vrot.lane.b32.xlu1 %v814_v43, %s3158_s22 }
 0x12a   : > { %2789 = vmatpush3.bf16.msra.mxu0 %v3009_v42 }
 0x12b   : > { %2790 = vmatprep.subr.bf16.mxu0 %v3156_v1 }
 0x12d   : > { %2765 = vmatmul.mubr.msk.bf16.vlgmr.msra.gmra.mrb[4].mxu1 %vm816_vm1, %v814_v43  ;;  %v3010_v43 = vld [vmem:[%s3786_s5 + $0x10] sm:$0xff]  }
 0x12e   : > { %2770 = vmatprep.mubr.msk.bf16.mxu1 %vm3157_vm0, %v3156_v1  ;;  %2769 = vmatpush3.bf16.msra.mxu1 %v884_v52 }
 0x12f   : > { %2774 = vmatprep.subr.bf16.mxu1 %v3156_v1  ;;  %2791 = vmatpush3.bf16.msra.mxu0 %v3010_v43 }
 0x130   : > { %2792 = vmatprep.subr.bf16.mxu0 %v3156_v1 }
 0x133   : > { %2793 = vmatpush3.bf16.msra.mxu0 %v3011_v45 }
 0x134   : > { %2794 = vmatprep.subr.bf16.mxu0 %v3156_v1 }
 0x137   : > { %2795 = vmatpush3.bf16.msra.mxu0 %v3012_v46 }
 0x138   : > { %2796 = vmatprep.subr.bf16.mxu0 %v3156_v1 }
 0x13b   : > { %2797 = vmatpush3.bf16.msra.mxu0 %v3013_v47 }
 0x13c   : > { %2798 = vmatprep.subr.bf16.mxu0 %v3156_v1 }
 0x13f   : > { %2799 = vmatpush3.bf16.msra.mxu0 %v3014_v48  ;;  %v3034_v48 = vld [vmem:[%s3784_s3 + $0xc4] ss:$12 sps:$4 sm:$0xff]  }
 0x140   : > { %2800 = vmatprep.subr.bf16.mxu0 %v3156_v1 }
 0x143   : > { %2801 = vmatpush3.bf16.msra.mxu0 %v3015_v49  ;;  %v3035_v49 = vld [vmem:[%s3784_s3 + $0xc8] ss:$12 sps:$4 sm:$0xff]  }
 0x144   : > { %2826 = vmatprep.subr.bf16.mxu0 %v3156_v1 }
 0x197   : > { %v931_v11 = vpop.permute.xlu1 %930 }
 0x198   : > { %v936_v13 = vsel %vm816_vm1, %v931_v11, 0  ;;  %v3023_v11 = vld [vmem:[%s3790_s9 + $0x38] sm:$0xff]  }
 0x19b   : > { %v928_v14 = vpop.permute.xlu1 %927 }
 0x200   : > { %v857_v58 = vpop.f32.mrb[4].mxu1 }
 0x201   : > { %v863_v59 = vmul.f32 0.25, %v857_v58  ;;  %v2766_v60 = vpop.f32.mrb[5].mxu1 }
 0x202   : > { %v860_v61 = vpop.f32.mrb[6].mxu1  ;;  %v2489_v60 = vld [vmem:[%s3787_s6] ss:$0 sm:$0xff] }
 0x203   : > { %v2767_v62 = vpop.f32.mrb[7].mxu1  ;;  %v864_v63 = vadd.f32 %v863_v59, %v3417_v57  ;;  %v3016_v59 = vld [vmem:[%s3790_s9] sm:$0xff]  }
 0x205   : > { %v866_v2 = vsel %vm865_vm4, %v864_v63, -inf }
 0x206   : > { %867 = vmax.xlane.f32.xlu0 %v866_v2 }
 0x293   : > { %v868_v3 = vpop.xlane.xlu0 %867 }
 0x294   : > { %v869_v4 = vsub.f32 %v864_v63, %v868_v3 }
 0x296   : > { %v870_v5 = vmul.f32 1.442695, %v869_v4 }
 0x298   : > { %3088 = vpow2.f32 %v870_v5 }
 0x2a2   : > { %v3089_v6 = vpop.eup %3088 }
 0x2a3   : > { %v872_v7 = vsel %vm865_vm4, %v3089_v6, 0.0 }
 0x2a4   : > { %873 = vadd.xlane.f32.xlu0 %v872_v7  ;;  %v3018_v7 = vld [vmem:[%s3790_s9 + $0x10] sm:$0xff]  }
 0x331   : > { %v874_v8 = vpop.xlane.xlu0 %873 }
 0x332   : > { %3090 = vrcp.f32 %v874_v8  ;;  %v3020_v8 = vld [vmem:[%s3790_s9 + $0x20] sm:$0xff]  }
 0x33c   : > { %v3091_v9 = vpop.eup %3090 }
 0x33d   : > { %v876_v10 = vmul.f32 %v3091_v9, %v3089_v6  ;;  %v3017_v6 = vld [vmem:[%s3790_s9 + $0x8] sm:$0xff]  }
 0x33e   : > { %v3021_v9 = vld [vmem:[%s3790_s9 + $0x28] sm:$0xff]  }
 0x33f   : > { %v877_v12 = vpack.c.bf16 %v876_v10, %v876_v10  ;;  %v3022_v10 = vld [vmem:[%s3790_s9 + $0x30] sm:$0xff]  }
 0x341   : > { %2771 = vmatmul.mubr.msk.bf16.vlgmr.msra.gmra.mrb[8].mxu1 %vm865_vm4, %v877_v12  ;;  %v3024_v12 = vld [vmem:[#allocation2] sm:$0xff]  }
 0x342   : > { %2775 = vmatpush3.bf16.xpose.msra.mxu1 %v936_v13  ;;  %2776 = vmatprep.mubr.msk.bf16.mxu1 %vm3157_vm0, %v3156_v1  ;;  %v3025_v13 = vld [vmem:[#allocation2 + $0x8] sm:$0xff]  }
 0x343   : > { %2780 = vmatprep.subr.bf16.mxu1 %v3156_v1 }
 0x349   : > { %2777 = vmatmul.mubr.msk.bf16.vlgmr.msra.gmra.mrb[12].mxu1 %vm816_vm1, %v928_v14  ;;  %v3026_v14 = vld [vmem:[#allocation2 + $0x10] sm:$0xff]  }
 0x34a   : > { %2782 = vmatprep.mubr.msk.bf16.mxu1 %vm3157_vm0, %v3156_v1 }
 0x414   : > { %v920_v15 = vpop.f32.mrb[8].mxu1 }
 0x415   : > { %v2772_v16 = vpop.f32.mrb[9].mxu1 }
 0x416   : > { %v923_v17 = vpop.f32.mrb[10].mxu1  ;;  %v3028_v16 = vld [vmem:[#allocation2 + $0x20] sm:$0xff]  }
 0x417   : > { %v2773_v18 = vpop.f32.mrb[11].mxu1  ;;  %v3029_v17 = vld [vmem:[#allocation2 + $0x28] sm:$0xff]  }
 0x41c   : > { %v972_v19 = vpop.f32.mrb[12].mxu1 }
 0x41d   : > { %v978_v20 = vmul.f32 0.25, %v972_v19  ;;  %v2778_v21 = vpop.f32.mrb[13].mxu1 }
 0x41e   : > { %v975_v22 = vpop.f32.mrb[14].mxu1 }
 0x41f   : > { %v2779_v24 = vpop.f32.mrb[15].mxu1  ;;  %v979_v25 = vadd.f32 %v978_v20, %v3417_v57 }
 0x421   : > { %v980_v26 = vsel %vm865_vm4, %v979_v25, -inf }
 0x422   : > { %981 = vmax.xlane.f32.xlu0 %v980_v26 }
 0x438   : > { %993 = vrot.lane.b32.xlu0 %v878_v50, %s3158_s22 }
 0x4af   : > { %v982_v27 = vpop.xlane.xlu0 %981 }
 0x4b0   : > { %v983_v28 = vsub.f32 %v979_v25, %v982_v27 }
 0x4b2   : > { %v984_v31 = vmul.f32 1.442695, %v983_v28  ;;  %v2498_v28 = vld [vmem:[%s3788_s7] ss:$0 sm:$0xff] }
 0x4b3   : > { %v994_v33 = vpop.permute.xlu0 %993 }
 0x4b4   : > { %3092 = vpow2.f32 %v984_v31  ;;  %v999_v34 = vsel %vm882_vm2, %v994_v33, 0  ;;  %v2499_v33 = vld [vmem:[%s3789_s8] ss:$0 sm:$0xff] }
 0x4b5   : > { %2781 = vmatpush3.bf16.msra.mxu1 %v999_v34 }
 0x4b6   : > { %2806 = vmatprep.subr.bf16.mxu1 %v3156_v1 }
 0x4be   : > { %v3093_v35 = vpop.eup %3092 }
 0x4bf   : > { %v986_v36 = vsel %vm865_vm4, %v3093_v35, 0.0 }
 0x4c0   : > { %987 = vadd.xlane.f32.xlu1 %v986_v36 }
 0x54d   : > { %v988_v37 = vpop.xlane.xlu1 %987 }
 0x54e   : > { %3094 = vrcp.f32 %v988_v37  ;;  %v3030_v37 = vld [vmem:[#allocation2 + $0x30] sm:$0xff]  }
 0x558   : > { %v3095_v38 = vpop.eup %3094 }
 0x559   : > { %v990_v39 = vmul.f32 %v3095_v38, %v3093_v35  ;;  %v3031_v38 = vld [vmem:[#allocation2 + $0x38] sm:$0xff]  }
 0x55b   : > { %v991_v40 = vpack.c.bf16 %v990_v39, %v990_v39  ;;  %v2500_v39 = vld [vmem:[%s3791_s10] ss:$0 sm:$0xff] }
 0x55d   : > { %2783 = vmatmul.mubr.msk.bf16.vlgmr.msra.gmra.mrb[16].mxu1 %vm865_vm4, %v991_v40 }
 0x55e   : > { %2822 = vmatprep.mubr.msk.bf16.mxu1 %vm3157_vm0, %v3156_v1  ;;  %2807 = vmatpush3.bf16.msra.mxu1 %v3016_v59 }
 0x55f   : > { %2808 = vmatprep.subr.bf16.mxu1 %v3156_v1 }
 0x562   : > { %2809 = vmatpush3.bf16.msra.mxu1 %v3017_v6  ;;  %v3047_v6 = vld [vmem:[%s3784_s3 + $0x110] ss:$12 sps:$4 sm:$0xff]  }
 0x563   : > { %2810 = vmatprep.subr.bf16.mxu1 %v3156_v1 }
 0x566   : > { %2811 = vmatpush3.bf16.msra.mxu1 %v3018_v7  ;;  %v3050_v7 = vld [vmem:[%s3784_s3 + $0x124] ss:$12 sps:$4 sm:$0xff]  }
 0x567   : > { %2812 = vmatprep.subr.bf16.mxu1 %v3156_v1 }
 0x630   : > { %v1035_v50 = vpop.f32.mrb[16].mxu1 }
 0x631   : > { %1042 = vrot.lane.b32.xlu0 %v1035_v50, %s3158_s22  ;;  %v2784_v51 = vpop.f32.mrb[17].mxu1  ;;  %v2509_v50 = vld [vmem:[%s3793_s12] ss:$0 sm:$0xff] }
 0x632   : > { %v1038_v52 = vpop.f32.mrb[18].mxu1 }
 0x633   : > { %v2785_v54 = vpop.f32.mrb[19].mxu1 }
 0x6a3   : > { %v1043_v55 = vpop.permute.xlu0 %1042 }
 0x6a4   : > { %v1045_v56 = vsel %vm816_vm1, %v920_v15, %v1043_v55  ;;  %v3027_v15 = vld [vmem:[#allocation2 + $0x18] sm:$0xff]  }
 0x6a5   : > { %v1046_v58 = vpack.c.bf16 %v1045_v56, %v1045_v56 }
 0x6a7   : > { %2803 = vmatmul.mubr.bf16.vlgmr.msra.gmra.mrb[4].mxu0 %v1046_v58 }
 0x6a8   : > { %2842 = vmatprep.mubr.msk.bf16.mxu0 %vm3157_vm0, %v3156_v1  ;;  %2827 = vmatpush3.bf16.msra.mxu0 %v3024_v12  ;;  %v3058_v12 = vld [vmem:[%s3784_s3 + $0x154] ss:$12 sps:$4 sm:$0xff]  }
 0x6a9   : > { %2828 = vmatprep.subr.bf16.mxu0 %v3156_v1 }
 0x6ac   : > { %2829 = vmatpush3.bf16.msra.mxu0 %v3025_v13  ;;  %v3056_v13 = vld [vmem:[%s3784_s3 + $0x150] ss:$12 sps:$4 sm:$0xff]  }
 0x6ad   : > { %2830 = vmatprep.subr.bf16.mxu0 %v3156_v1 }
 0x6b0   : > { %2831 = vmatpush3.bf16.msra.mxu0 %v3026_v14  ;;  %v3059_v14 = vld [vmem:[%s3784_s3 + $0x158] ss:$12 sps:$4 sm:$0xff]  }
 0x6b1   : > { %2832 = vmatprep.subr.bf16.mxu0 %v3156_v1 }
 0x6b4   : > { %2833 = vmatpush3.bf16.msra.mxu0 %v3027_v15  ;;  %v3062_v15 = vld [vmem:[%s3784_s3 + $0x16c] ss:$12 sps:$4 sm:$0xff]  }
 0x6b5   : > { %2834 = vmatprep.subr.bf16.mxu0 %v3156_v1 }
 0x6b8   : > { %2835 = vmatpush3.bf16.msra.mxu0 %v3028_v16  ;;  %v3060_v16 = vld [vmem:[%s3784_s3 + $0x168] ss:$12 sps:$4 sm:$0xff]  }
 0x6b9   : > { %2836 = vmatprep.subr.bf16.mxu0 %v3156_v1 }
 0x6bc   : > { %2837 = vmatpush3.bf16.msra.mxu0 %v3029_v17  ;;  %v3063_v17 = vld [vmem:[%s3784_s3 + $0x170] ss:$12 sps:$4 sm:$0xff]  }
 0x6bd   : > { %2838 = vmatprep.subr.bf16.mxu0 %v3156_v1 }
 0x6c0   : > { %2839 = vmatpush3.bf16.msra.mxu0 %v3030_v37  ;;  %v2552_v37 = vld [vmem:[%s3785_s4 + $0x3] sm:$0x7] }
 0x6c1   : > { %2840 = vmatprep.subr.bf16.mxu0 %v3156_v1 }
 0x6c4   : > { %2841 = vmatpush3.bf16.msra.mxu0 %v3031_v38  ;;  %v1483_v38 = vrot.slane %v2552_v37, %v592_v32 }
 0x6c5   : > { %2846 = vmatprep.subr.bf16.mxu0 %v3156_v1 }
 0x77a   : > { %v1152_v61 = vpop.f32.mrb[4].mxu0 }
 0x77b   : > { %v1153_v62 = vadd.f32 %v2489_v60, %v1152_v61  ;;  %v2804_v63 = vpop.f32.mrb[5].mxu0  ;;  %v3038_v60 = vld [vmem:[%s3784_s3 + $0xdc] ss:$12 sps:$4 sm:$0xff]   ;;  %v3036_v61 = vld [vmem:[%s3784_s3 + $0xd8] ss:$12 sps:$4 sm:$0xff]  }
 0x77c   : > { %v1155_v2 = vpop.f32.mrb[6].mxu0  ;;  %v3042_v63 = vld [vmem:[%s3784_s3 + $0xf4] ss:$12 sps:$4 sm:$0xff]  }
 0x77d   : > { %v1158_v3 = vadd.f32 %v1153_v62, %v3361_v23  ;;  %v2805_v4 = vpop.f32.mrb[7].mxu0  ;;  %v3019_v23 = vld [vmem:[%s3790_s9 + $0x18] sm:$0xff]   ;;  %v3039_v62 = vld [vmem:[%s3784_s3 + $0xe0] ss:$12 sps:$4 sm:$0xff]  }
 0x77e   : > { %2813 = vmatpush3.bf16.msra.mxu1 %v3019_v23  ;;  %v3040_v2 = vld [vmem:[%s3784_s3 + $0xf0] ss:$12 sps:$4 sm:$0xff]   ;;  %v3046_v4 = vld [vmem:[%s3784_s3 + $0x10c] ss:$12 sps:$4 sm:$0xff]  }
 0x77f   : > { %1161 = vadd.xlane.f32.xlu0 %v1158_v3  ;;  %v1164_v5 = vmul.f32 %v1158_v3, %v1158_v3  ;;  %2814 = vmatprep.subr.bf16.mxu1 %v3156_v1  ;;  %v3048_v23 = vld [vmem:[%s3784_s3 + $0x120] ss:$12 sps:$4 sm:$0xff]  }
 0x781   : > { %1165 = vadd.xlane.f32.xlu1 %v1164_v5  ;;  %v3044_v5 = vld [vmem:[%s3784_s3 + $0x108] ss:$12 sps:$4 sm:$0xff]  }
 0x782   : > { %2815 = vmatpush3.bf16.msra.mxu1 %v3020_v8  ;;  %v3051_v8 = vld [vmem:[%s3784_s3 + $0x128] ss:$12 sps:$4 sm:$0xff]  }
 0x783   : > { %2816 = vmatprep.subr.bf16.mxu1 %v3156_v1 }
 0x786   : > { %2817 = vmatpush3.bf16.msra.mxu1 %v3021_v9  ;;  %v3054_v9 = vld [vmem:[%s3784_s3 + $0x13c] ss:$12 sps:$4 sm:$0xff]  }
 0x787   : > { %2818 = vmatprep.subr.bf16.mxu1 %v3156_v1 }
 0x78a   : > { %2819 = vmatpush3.bf16.msra.mxu1 %v3022_v10  ;;  %v3052_v10 = vld [vmem:[%s3784_s3 + $0x138] ss:$12 sps:$4 sm:$0xff]  }
 0x78b   : > { %2820 = vmatprep.subr.bf16.mxu1 %v3156_v1 }
 0x78e   : > { %2821 = vmatpush3.bf16.msra.mxu1 %v3023_v11  ;;  %v3055_v11 = vld [vmem:[%s3784_s3 + $0x140] ss:$12 sps:$4 sm:$0xff]  }
 0x78f   : > { %1623 = vmatprep.subr.bf16.mxu1 %v3034_v48 }
 0x80c   : > { %v1162_v18 = vpop.xlane.xlu0 %1161 }
 0x80d   : > { %v1163_v19 = vmul.f32 0.03125, %v1162_v18 }
 0x80e   : > { %v1166_v20 = vpop.xlane.xlu1 %1165 }
 0x80f   : > { %v1168_v21 = vmul.f32 %v1163_v19, %v1163_v19  ;;  %v1167_v22 = vmul.f32 0.03125, %v1166_v20  ;;  %v1170_v26 = vsub.f32 %v1158_v3, %v1163_v19  ;;  %v3043_v3 = vld [vmem:[%s3784_s3 + $0xf8] ss:$12 sps:$4 sm:$0xff]  }
 0x811   : > { %v1169_v24 = vsub.f32 %v1167_v22, %v1168_v21 }
 0x813   : > { %v1171_v25 = vadd.f32 1e-05, %v1169_v24 }
 0x815   : > { %3096 = vrsqrt.f32 %v1171_v25 }
 0x81f   : > { %v3097_v27 = vpop.eup %3096 }
 0x820   : > { %v1173_v31 = vmul.f32 %v3097_v27, %v1170_v26 }
 0x822   : > { %v1180_v34 = vmul.f32 %v2498_v28, %v1173_v31  ;;  %v2518_v28 = vld [vmem:[%s3794_s13] ss:$0 sm:$0xff] }
 0x824   : > { %v1187_v35 = vadd.f32 %v2499_v33, %v1180_v34  ;;  %v2519_v33 = vld [vmem:[%s3795_s14] ss:$0 sm:$0xff] }
 0x826   : > { %v1188_v36 = vpack.c.bf16 %v1187_v35, %v1187_v35 }
 0x828   : > { %2823 = vmatmul.mubr.bf16.vlgmr.msra.gmra.mrb[20].mxu1 %v1188_v36 }
 0x829   : > { %1655 = vmatprep.mubr.bf16.mxu1 %v3155_v0  ;;  %v3032_v0 = vld [vmem:[%s3784_s3 + $0xc0] ss:$12 sps:$4 sm:$0xff]  }
 0x82a   : > { %1624 = vmatpush1.bf16.msra.mxu1 %v3032_v0 }
 0x82b   : > { %1625 = vmatprep.subr.bf16.mxu1 %v3038_v60 }
 0x82e   : > { %1626 = vmatpush1.bf16.msra.mxu1 %v3036_v61 }
 0x82f   : > { %1627 = vmatprep.subr.bf16.mxu1 %v3042_v63 }
 0x832   : > { %1628 = vmatpush1.bf16.msra.mxu1 %v3040_v2 }
 0x833   : > { %1629 = vmatprep.subr.bf16.mxu1 %v3046_v4 }
 0x836   : > { %1630 = vmatpush1.bf16.msra.mxu1 %v3044_v5 }
 0x837   : > { %1631 = vmatprep.subr.bf16.mxu1 %v3050_v7 }
 0x83a   : > { %1632 = vmatpush1.bf16.msra.mxu1 %v3048_v23 }
 0x83b   : > { %1633 = vmatprep.subr.bf16.mxu1 %v3054_v9 }
 0x83e   : > { %1634 = vmatpush1.bf16.msra.mxu1 %v3052_v10 }
 0x83f   : > { %1635 = vmatprep.subr.bf16.mxu1 %v3058_v12 }
 0x842   : > { %1636 = vmatpush1.bf16.msra.mxu1 %v3056_v13 }
 0x843   : > { %1637 = vmatprep.subr.bf16.mxu1 %v3062_v15 }
 0x846   : > { %1638 = vmatpush1.bf16.msra.mxu1 %v3060_v16 }
 0x847   : > { %2866 = vmatprep.subr.bf16.mxu1 %v3156_v1 }
 0x8fb   : > { %v1294_v40 = vpop.f32.mrb[20].mxu1 }
 0x8fc   : > { %v1295_v41 = vadd.f32 %v2500_v39, %v1294_v40  ;;  %v2824_v42 = vpop.f32.mrb[21].mxu1  ;;  %v1487_v39 = vrot.slane %v2552_v37, %v596_v30 }
 0x8fd   : > { %v1297_v43 = vpop.f32.mrb[22].mxu1 }
 0x8fe   : > { %v1300_v45 = vmax.f32 %v1295_v41, 0.0  ;;  %v2825_v46 = vpop.f32.mrb[23].mxu1 }
 0x8ff   : > { %v1491_v46 = vrot.slane %v2552_v37, %v600_v44 }
 0x900   : > { %v1301_v47 = vpack.c.bf16 %v1300_v45, %v1300_v45 }
 0x902   : > { %2843 = vmatmul.mubr.bf16.vlgmr.msra.gmra.mrb[8].mxu0 %v1301_v47 }
 0x903   : > { %2862 = vmatprep.mubr.msk.bf16.mxu0 %vm3157_vm0, %v3156_v1  ;;  %2847 = vmatpush3.bf16.msra.mxu0 %v3035_v49 }
 0x904   : > { %2848 = vmatprep.subr.bf16.mxu0 %v3156_v1 }
 0x907   : > { %2849 = vmatpush3.bf16.msra.mxu0 %v3039_v62 }
 0x908   : > { %2850 = vmatprep.subr.bf16.mxu0 %v3156_v1 }
 0x90b   : > { %2851 = vmatpush3.bf16.msra.mxu0 %v3043_v3 }
 0x90c   : > { %2852 = vmatprep.subr.bf16.mxu0 %v3156_v1 }
 0x90f   : > { %2853 = vmatpush3.bf16.msra.mxu0 %v3047_v6 }
 0x910   : > { %2854 = vmatprep.subr.bf16.mxu0 %v3156_v1 }
 0x913   : > { %2855 = vmatpush3.bf16.msra.mxu0 %v3051_v8 }
 0x914   : > { %2856 = vmatprep.subr.bf16.mxu0 %v3156_v1 }
 0x917   : > { %2857 = vmatpush3.bf16.msra.mxu0 %v3055_v11 }
 0x918   : > { %2858 = vmatprep.subr.bf16.mxu0 %v3156_v1 }
 0x91b   : > { %2859 = vmatpush3.bf16.msra.mxu0 %v3059_v14 }
 0x91c   : > { %2860 = vmatprep.subr.bf16.mxu0 %v3156_v1 }
 0x91f   : > { %2861 = vmatpush3.bf16.msra.mxu0 %v3063_v17 }
 0x920   : > { %2890 = vmatprep.subr.bf16.mxu0 %v3156_v1 }
 0x9d5   : > { %v1407_v51 = vpop.f32.mrb[8].mxu0 }
 0x9d6   : > { %v1408_v52 = vadd.f32 %v2509_v50, %v1407_v51  ;;  %v2844_v54 = vpop.f32.mrb[9].mxu0 }
 0x9d7   : > { %v1410_v55 = vpop.f32.mrb[10].mxu0 }
 0x9d8   : > { %v3543_v56 = vadd.f32 %v1408_v52, %v1187_v35  ;;  %v2845_v58 = vpop.f32.mrb[11].mxu0 }
 0x9da   : > { %1416 = vadd.xlane.f32.xlu1 %v3543_v56  ;;  %v1419_v59 = vmul.f32 %v3543_v56, %v3543_v56 }
 0x9de   : > { %1420 = vadd.xlane.f32.xlu1 %v1419_v59 }
 0xa67   : > { %v1417_v18 = vpop.xlane.xlu1 %1416 }
 0xa68   : > { %v1418_v19 = vmul.f32 0.03125, %v1417_v18 }
 0xa6a   : > { %v1423_v21 = vmul.f32 %v1418_v19, %v1418_v19  ;;  %v1425_v26 = vsub.f32 %v3543_v56, %v1418_v19 }
 0xa6b   : > { %v1421_v20 = vpop.xlane.xlu1 %1420 }
 0xa6c   : > { %v1422_v22 = vmul.f32 0.03125, %v1421_v20 }
 0xa6e   : > { %v1424_v24 = vsub.f32 %v1422_v22, %v1423_v21 }
 0xa70   : > { %v1426_v25 = vadd.f32 1e-05, %v1424_v24 }
 0xa72   : > { %3098 = vrsqrt.f32 %v1426_v25 }
 0xa7c   : > { %v3099_v27 = vpop.eup %3098 }
 0xa7d   : > { %v1428_v31 = vmul.f32 %v3099_v27, %v1425_v26 }
 0xa7f   : > { %v1435_v34 = vmul.f32 %v2518_v28, %v1428_v31 }
 0xa81   : > { %v3626_v35 = vadd.f32 %v2519_v33, %v1435_v34 }
 0xa83   : > { %v1443_v36 = vpack.c.bf16 %v3626_v35, %v3626_v35 }
 0xa85   : > { %1656 = vmatmul.mubr.bf16.vlgmr.msra.gmra.mrb[24].mxu1 %v1443_v36  ;;  %2863 = vmatmul.mubr.bf16.vlgmr.msra.gmra.mrb[12].mxu0 %v1443_v36 }
 0xa86   : > { %2868 = vmatprep.mubr.msk.bf16.mxu1 %vm3157_vm0, %v3156_v1  ;;  %2906 = vmatprep.mubr.msk.bf16.mxu0 %vm3157_vm0, %v3156_v1 }
 0xb58   : > { %v1657_v40 = vpop.f32.mrb[24].mxu1  ;;  %v1698_v41 = vpop.f32.mrb[12].mxu0 }
 0xb59   : > { %v1658_v42 = vadd.f32 %v1657_v40, %v1483_v38  ;;  %v1659_v43 = vpop.f32.mrb[25].mxu1  ;;  %v2864_v45 = vpop.f32.mrb[13].mxu0  ;;  %v1699_v32 = vadd.f32 %v1698_v41, %v1491_v46  ;;  %v3064_v38 = vld [vmem:[%s3786_s5 + $0x40] sm:$0xff]   ;;  %v3066_v40 = vld [vmem:[%s3786_s5 + $0x50] sm:$0xff]   ;;  %v3067_v41 = vld [vmem:[%s3786_s5 + $0x58] sm:$0xff]  }
 0xb5a   : > { %v1660_v47 = vadd.f32 %v1659_v43, %v1487_v39  ;;  %v1661_v0 = vpop.f32.mrb[26].mxu1  ;;  %v1701_v48 = vpop.f32.mrb[14].mxu0  ;;  %2891 = vmatpush3.bf16.msra.mxu0 %v3064_v38  ;;  %v3065_v39 = vld [vmem:[%s3786_s5 + $0x48] sm:$0xff]   ;;  %v3070_v45 = vld [vmem:[%s3786_s5 + $0x70] sm:$0xff]   ;;  %v3071_v46 = vld [vmem:[%s3786_s5 + $0x78] sm:$0xff]  }
 0xb5b   : > { %v1704_v49 = vpack.c.bf16 %v1658_v42, %v1658_v42  ;;  %v1662_v50 = vpop.f32.mrb[27].mxu1  ;;  %v2865_v51 = vpop.f32.mrb[15].mxu0  ;;  %v1766_v54 = vpack.c.bf16 %v1699_v32, %v1699_v32  ;;  %2892 = vmatprep.subr.bf16.mxu0 %v3156_v1  ;;  %v3068_v42 = vld [vmem:[%s3786_s5 + $0x60] sm:$0xff]   ;;  %v3069_v43 = vld [vmem:[%s3786_s5 + $0x68] sm:$0xff]  }
 0xb5c   : > { %v1705_v52 = vpack.c.bf16 %v1660_v47, %v1660_v47  ;;  %v3072_v32 = vld [vmem:[%s3790_s9 + $0x40] sm:$0xff]  }
 0xb5d   : > { %1814 = vrot.lane.b32.xlu0 %v1704_v49, %s3158_s22  ;;  %v1771_v55 = vsel %vm882_vm2, %v1766_v54, 0 }
 0xb5e   : > { %v1710_v30 = vsel %vm816_vm1, %v1705_v52, 0  ;;  %2893 = vmatpush3.bf16.msra.mxu0 %v3065_v39  ;;  %v2638_v39 = vld [vmem:[%s3793_s12 + $0x1] ss:$0 sm:$0xff] }
 0xb5f   : > { %2867 = vmatpush3.bf16.xpose.msra.mxu1 %v1710_v30  ;;  %2894 = vmatprep.subr.bf16.mxu0 %v3156_v1  ;;  %v2598_v30 = vld [vmem:[%s3787_s6 + $0x1] ss:$0 sm:$0xff] }
 0xb60   : > { %2872 = vmatprep.subr.bf16.mxu1 %v3156_v1 }
 0xb62   : > { %2895 = vmatpush3.bf16.msra.mxu0 %v3066_v40 }
 0xb63   : > { %2896 = vmatprep.subr.bf16.mxu0 %v3156_v1 }
 0xb66   : > { %2869 = vmatmul.mubr.msk.bf16.vlgmr.msra.gmra.mrb[28].mxu1 %vm816_vm1, %v1704_v49  ;;  %2897 = vmatpush3.bf16.msra.mxu0 %v3067_v41 }
 0xb67   : > { %2873 = vmatpush3.bf16.msra.mxu1 %v1771_v55  ;;  %2874 = vmatprep.mubr.msk.bf16.mxu1 %vm3157_vm0, %v3156_v1 }
 0xb68   : > { %2878 = vmatprep.subr.bf16.mxu1 %v3156_v1  ;;  %2898 = vmatprep.subr.bf16.mxu0 %v3156_v1 }
 0xb6a   : > { %2899 = vmatpush3.bf16.msra.mxu0 %v3068_v42 }
 0xb6b   : > { %2900 = vmatprep.subr.bf16.mxu0 %v3156_v1 }
 0xb6e   : > { %2901 = vmatpush3.bf16.msra.mxu0 %v3069_v43 }
 0xb6f   : > { %2902 = vmatprep.subr.bf16.mxu0 %v3156_v1 }
 0xb72   : > { %2903 = vmatpush3.bf16.msra.mxu0 %v3070_v45 }
 0xb73   : > { %2904 = vmatprep.subr.bf16.mxu0 %v3156_v1 }
 0xb76   : > { %2905 = vmatpush3.bf16.msra.mxu0 %v3071_v46 }
 0xb77   : > { %2930 = vmatprep.subr.bf16.mxu0 %v3156_v1 }
 0xbcf   : > { %v1815_v11 = vpop.permute.xlu0 %1814 }
 0xc39   : > { %v1746_v44 = vpop.f32.mrb[28].mxu1 }
 0xc3a   : > { %v1752_v56 = vmul.f32 0.25, %v1746_v44  ;;  %v2870_v58 = vpop.f32.mrb[29].mxu1 }
 0xc3b   : > { %v1749_v59 = vpop.f32.mrb[30].mxu1 }
 0xc3c   : > { %v2871_v60 = vpop.f32.mrb[31].mxu1  ;;  %v1753_v61 = vadd.f32 %v1752_v56, %v3417_v57 }
 0xc3e   : > { %v1754_v62 = vsel %vm865_vm4, %v1753_v61, -inf }
 0xc3f   : > { %1755 = vmax.xlane.f32.xlu1 %v1754_v62  ;;  %v3074_v62 = vld [vmem:[%s3790_s9 + $0x50] sm:$0xff]  }
 0xccc   : > { %v1756_v63 = vpop.xlane.xlu1 %1755 }
 0xccd   : > { %v1757_v2 = vsub.f32 %v1753_v61, %v1756_v63  ;;  %v3073_v61 = vld [vmem:[%s3790_s9 + $0x48] sm:$0xff]   ;;  %v3076_v63 = vld [vmem:[%s3790_s9 + $0x60] sm:$0xff]  }
 0xccf   : > { %v1758_v3 = vmul.f32 1.442695, %v1757_v2  ;;  %v3077_v2 = vld [vmem:[%s3790_s9 + $0x68] sm:$0xff]  }
 0xcd1   : > { %3100 = vpow2.f32 %v1758_v3  ;;  %v3078_v3 = vld [vmem:[%s3790_s9 + $0x70] sm:$0xff]  }
 0xcdb   : > { %v3101_v4 = vpop.eup %3100 }
 0xcdc   : > { %v1760_v5 = vsel %vm865_vm4, %v3101_v4, 0.0 }
 0xcdd   : > { %1761 = vadd.xlane.f32.xlu1 %v1760_v5  ;;  %v3080_v5 = vld [vmem:[#allocation2 + $0x40] sm:$0xff]  }
 0xcee   : > { %1817 = vrot.lane.b32.xlu1 %v1705_v52, %s3158_s22 }
 0xd6a   : > { %v1762_v6 = vpop.xlane.xlu1 %1761 }
 0xd6b   : > { %3102 = vrcp.f32 %v1762_v6  ;;  %v3081_v6 = vld [vmem:[#allocation2 + $0x48] sm:$0xff]  }
 0xd6e   : > { %v1818_v8 = vpop.permute.xlu1 %1817 }
 0xd6f   : > { %v1823_v10 = vsel %vm816_vm1, %v1818_v8, 0  ;;  %v3084_v8 = vld [vmem:[#allocation2 + $0x60] sm:$0xff]  }
 0xd75   : > { %v3103_v7 = vpop.eup %3102 }
 0xd76   : > { %v1764_v23 = vmul.f32 %v3103_v7, %v3101_v4  ;;  %v3079_v4 = vld [vmem:[%s3790_s9 + $0x78] sm:$0xff]   ;;  %v3082_v7 = vld [vmem:[#allocation2 + $0x50] sm:$0xff]  }
 0xd78   : > { %v1765_v9 = vpack.c.bf16 %v1764_v23, %v1764_v23  ;;  %v3083_v23 = vld [vmem:[#allocation2 + $0x58] sm:$0xff]  }
 0xd7a   : > { %2875 = vmatmul.mubr.msk.bf16.vlgmr.msra.gmra.mrb[32].mxu1 %vm865_vm4, %v1765_v9  ;;  %v3085_v9 = vld [vmem:[#allocation2 + $0x68] sm:$0xff]  }
 0xd7b   : > { %2879 = vmatpush3.bf16.xpose.msra.mxu1 %v1823_v10  ;;  %2880 = vmatprep.mubr.msk.bf16.mxu1 %vm3157_vm0, %v3156_v1 }
 0xd7c   : > { %2884 = vmatprep.subr.bf16.mxu1 %v3156_v1 }
 0xd82   : > { %2881 = vmatmul.mubr.msk.bf16.vlgmr.msra.gmra.mrb[36].mxu1 %vm816_vm1, %v1815_v11 }
 0xd83   : > { %2886 = vmatprep.mubr.msk.bf16.mxu1 %vm3157_vm0, %v3156_v1 }
 0xe4d   : > { %v1807_v12 = vpop.f32.mrb[32].mxu1 }
 0xe4e   : > { %v2876_v13 = vpop.f32.mrb[33].mxu1 }
 0xe4f   : > { %v1810_v14 = vpop.f32.mrb[34].mxu1 }
 0xe50   : > { %v2877_v15 = vpop.f32.mrb[35].mxu1 }
 0xe55   : > { %v1859_v16 = vpop.f32.mrb[36].mxu1 }
 0xe56   : > { %v1865_v17 = vmul.f32 0.25, %v1859_v16  ;;  %v2882_v18 = vpop.f32.mrb[37].mxu1 }
 0xe57   : > { %v1862_v19 = vpop.f32.mrb[38].mxu1 }
 0xe58   : > { %v2883_v20 = vpop.f32.mrb[39].mxu1  ;;  %v1866_v21 = vadd.f32 %v1865_v17, %v3417_v57  ;;  %v2609_v19 = vld [vmem:[%s3788_s7 + $0x1] ss:$0 sm:$0xff] }
 0xe5a   : > { %v1867_v22 = vsel %vm865_vm4, %v1866_v21, -inf }
 0xe5b   : > { %1868 = vmax.xlane.f32.xlu1 %v1867_v22 }
 0xe6c   : > { %1880 = vrot.lane.b32.xlu1 %v1766_v54, %s3158_s22 }
 0xee8   : > { %v1869_v24 = vpop.xlane.xlu1 %1868 }
 0xee9   : > { %v1870_v25 = vsub.f32 %v1866_v21, %v1869_v24  ;;  %v2610_v21 = vld [vmem:[%s3789_s8 + $0x1] ss:$0 sm:$0xff] }
 0xeeb   : > { %v1871_v26 = vmul.f32 1.442695, %v1870_v25 }
 0xeec   : > { %v1881_v27 = vpop.permute.xlu1 %1880 }
 0xeed   : > { %3104 = vpow2.f32 %v1871_v26  ;;  %v1886_v28 = vsel %vm882_vm2, %v1881_v27, 0  ;;  %v3086_v26 = vld [vmem:[#allocation2 + $0x70] sm:$0xff]   ;;  %v3087_v27 = vld [vmem:[#allocation2 + $0x78] sm:$0xff]  }
 0xeee   : > { %2885 = vmatpush3.bf16.msra.mxu1 %v1886_v28  ;;  %v2628_v28 = vld [vmem:[%s3791_s10 + $0x1] ss:$0 sm:$0xff] }
 0xeef   : > { %2910 = vmatprep.subr.bf16.mxu1 %v3156_v1 }
 0xef7   : > { %v3105_v31 = vpop.eup %3104 }
 0xef8   : > { %v1873_v33 = vsel %vm865_vm4, %v3105_v31, 0.0 }
 0xef9   : > { %1874 = vadd.xlane.f32.xlu0 %v1873_v33 }
 0xf86   : > { %v1875_v57 = vpop.xlane.xlu0 %1874 }
 0xf87   : > { %3106 = vrcp.f32 %v1875_v57 }
 0xf91   : > { %v3107_v34 = vpop.eup %3106 }
 0xf92   : > { %v1877_v36 = vmul.f32 %v3107_v34, %v3105_v31 }
 0xf94   : > { %v1878_v37 = vpack.c.bf16 %v1877_v36, %v1877_v36 }
 0xf96   : > { %2887 = vmatmul.mubr.msk.bf16.vlgmr.msra.gmra.mrb[40].mxu1 %vm865_vm4, %v1878_v37 }
 0xf97   : > { %2926 = vmatprep.mubr.msk.bf16.mxu1 %vm3157_vm0, %v3156_v1  ;;  %2911 = vmatpush3.bf16.msra.mxu1 %v3072_v32 }
 0xf98   : > { %2912 = vmatprep.subr.bf16.mxu1 %v3156_v1 }
 0xf9b   : > { %2913 = vmatpush3.bf16.msra.mxu1 %v3073_v61 }
 0xf9c   : > { %2914 = vmatprep.subr.bf16.mxu1 %v3156_v1 }
 0xf9f   : > { %2915 = vmatpush3.bf16.msra.mxu1 %v3074_v62 }
 0xfa0   : > { %2916 = vmatprep.subr.bf16.mxu1 %v3156_v1 }
0x1069   : > { %v1922_v47 = vpop.f32.mrb[40].mxu1 }
0x106a   : > { %1929 = vrot.lane.b32.xlu0 %v1922_v47, %s3158_s22  ;;  %v2888_v0 = vpop.f32.mrb[41].mxu1 }
0x106b   : > { %v1925_v48 = vpop.f32.mrb[42].mxu1 }
0x106c   : > { %v2889_v49 = vpop.f32.mrb[43].mxu1 }
0x10dc   : > { %v1930_v50 = vpop.permute.xlu0 %1929 }
0x10dd   : > { %v1932_v51 = vsel %vm816_vm1, %v1807_v12, %v1930_v50 }
0x10de   : > { %v1933_v52 = vpack.c.bf16 %v1932_v51, %v1932_v51 }
0x10e0   : > { %2907 = vmatmul.mubr.bf16.vlgmr.msra.gmra.mrb[16].mxu0 %v1933_v52 }
0x10e1   : > { %2946 = vmatprep.mubr.msk.bf16.mxu0 %vm3157_vm0, %v3156_v1  ;;  %2931 = vmatpush3.bf16.msra.mxu0 %v3080_v5 }
0x10e2   : > { %2932 = vmatprep.subr.bf16.mxu0 %v3156_v1 }
0x10e5   : > { %2933 = vmatpush3.bf16.msra.mxu0 %v3081_v6 }
0x10e6   : > { %2934 = vmatprep.subr.bf16.mxu0 %v3156_v1 }
0x10e9   : > { %2935 = vmatpush3.bf16.msra.mxu0 %v3082_v7 }
0x10ea   : > { %2936 = vmatprep.subr.bf16.mxu0 %v3156_v1 }
0x10ed   : > { %2937 = vmatpush3.bf16.msra.mxu0 %v3083_v23 }
0x10ee   : > { %2938 = vmatprep.subr.bf16.mxu0 %v3156_v1 }
0x10f1   : > { %2939 = vmatpush3.bf16.msra.mxu0 %v3084_v8 }
0x10f2   : > { %2940 = vmatprep.subr.bf16.mxu0 %v3156_v1 }
0x10f5   : > { %2941 = vmatpush3.bf16.msra.mxu0 %v3085_v9 }
0x10f6   : > { %2942 = vmatprep.subr.bf16.mxu0 %v3156_v1 }
0x10f9   : > { %2943 = vmatpush3.bf16.msra.mxu0 %v3086_v26 }
0x10fa   : > { %2944 = vmatprep.subr.bf16.mxu0 %v3156_v1 }
0x10fd   : > { %2945 = vmatpush3.bf16.msra.mxu0 %v3087_v27 }
0x11b3   : > { %v2041_v54 = vpop.f32.mrb[16].mxu0 }
0x11b4   : > { %v2042_v55 = vadd.f32 %v2598_v30, %v2041_v54  ;;  %v2908_v44 = vpop.f32.mrb[17].mxu0  ;;  %v2649_v54 = vld [vmem:[%s3794_s13 + $0x1] ss:$0 sm:$0xff] }
0x11b5   : > { %v2044_v56 = vpop.f32.mrb[18].mxu0  ;;  %v2650_v44 = vld [vmem:[%s3795_s14 + $0x1] ss:$0 sm:$0xff] }
0x11b6   : > { %v2047_v58 = vadd.f32 %v2042_v55, %v3626_v35  ;;  %v2909_v59 = vpop.f32.mrb[19].mxu0  ;;  %v3075_v35 = vld [vmem:[%s3790_s9 + $0x58] sm:$0xff]  }
0x11b7   : > { %2917 = vmatpush3.bf16.msra.mxu1 %v3075_v35  ;;  %v2340_v59 = vld [vmem:[%s534_s21] sm:$0xff]  ;;  %v2352_v35 = vsub.s32 %v3409_v53, %v3386_v29 }
0x11b8   : > { %2052 = vadd.xlane.f32.xlu1 %v2047_v58  ;;  %v2055_v60 = vmul.f32 %v2047_v58, %v2047_v58  ;;  %2918 = vmatprep.subr.bf16.mxu1 %v3156_v1 }
0x11ba   : > { %2056 = vadd.xlane.f32.xlu0 %v2055_v60 }
0x11bb   : > { %2919 = vmatpush3.bf16.msra.mxu1 %v3076_v63 }
0x11bc   : > { %2920 = vmatprep.subr.bf16.mxu1 %v3156_v1 }
0x11bf   : > { %2921 = vmatpush3.bf16.msra.mxu1 %v3077_v2 }
0x11c0   : > { %2922 = vmatprep.subr.bf16.mxu1 %v3156_v1 }
0x11c3   : > { %2923 = vmatpush3.bf16.msra.mxu1 %v3078_v3 }
0x11c4   : > { %2924 = vmatprep.subr.bf16.mxu1 %v3156_v1 }
0x11c7   : > { %2925 = vmatpush3.bf16.msra.mxu1 %v3079_v4 }
0x1245   : > { %v2053_v10 = vpop.xlane.xlu1 %2052 }
0x1246   : > { %v2054_v11 = vmul.f32 0.03125, %v2053_v10 }
0x1247   : > { %v2057_v12 = vpop.xlane.xlu0 %2056 }
0x1248   : > { %v2059_v13 = vmul.f32 %v2054_v11, %v2054_v11  ;;  %v2058_v14 = vmul.f32 0.03125, %v2057_v12  ;;  %v2061_v17 = vsub.f32 %v2047_v58, %v2054_v11  ;;  %v2341_v58 = vld [vmem:[%s534_s21 + $0x8] sm:$0xff] }
0x124a   : > { %v2060_v15 = vsub.f32 %v2058_v14, %v2059_v13 }
0x124c   : > { %v2062_v16 = vadd.f32 1e-05, %v2060_v15 }
0x124e   : > { %3108 = vrsqrt.f32 %v2062_v16 }
0x1258   : > { %v3109_v18 = vpop.eup %3108 }
0x1259   : > { %v2064_v20 = vmul.f32 %v3109_v18, %v2061_v17 }
0x125b   : > { %v2071_v22 = vmul.f32 %v2609_v19, %v2064_v20 }
0x125d   : > { %v2078_v24 = vadd.f32 %v2610_v21, %v2071_v22 }
0x125f   : > { %v2079_v25 = vpack.c.bf16 %v2078_v24, %v2078_v24 }
0x1261   : > { %2927 = vmatmul.mubr.bf16.vlgmr.msra.gmra.mrb[44].mxu1 %v2079_v25 }
0x1334   : > { %v2187_v31 = vpop.f32.mrb[44].mxu1 }
0x1335   : > { %v2188_v33 = vadd.f32 %v2628_v28, %v2187_v31  ;;  %v2928_v57 = vpop.f32.mrb[45].mxu1 }
0x1336   : > { %v2190_v34 = vpop.f32.mrb[46].mxu1 }
0x1337   : > { %v2193_v36 = vmax.f32 %v2188_v33, 0.0  ;;  %v2929_v37 = vpop.f32.mrb[47].mxu1 }
0x1339   : > { %v2194_v38 = vpack.c.bf16 %v2193_v36, %v2193_v36 }
0x133b   : > { %2947 = vmatmul.mubr.bf16.vlgmr.msra.gmra.mrb[20].mxu0 %v2194_v38 }
0x140e   : > { %v2302_v40 = vpop.f32.mrb[20].mxu0 }
0x140f   : > { %v2303_v1 = vadd.f32 %v2638_v39, %v2302_v40  ;;  %v2948_v41 = vpop.f32.mrb[21].mxu0 }
0x1410   : > { %v2305_v42 = vpop.f32.mrb[22].mxu0 }
0x1411   : > { %v2308_v43 = vadd.f32 %v2303_v1, %v2078_v24  ;;  %v2949_v45 = vpop.f32.mrb[23].mxu0 }
0x1413   : > { %2313 = vadd.xlane.f32.xlu1 %v2308_v43  ;;  %v2316_v46 = vmul.f32 %v2308_v43, %v2308_v43 }
0x1417   : > { %2317 = vadd.xlane.f32.xlu1 %v2316_v46 }
0x14a0   : > { %v2314_v47 = vpop.xlane.xlu1 %2313 }
0x14a1   : > { %v2315_v0 = vmul.f32 0.03125, %v2314_v47 }
0x14a3   : > { %v2320_v49 = vmul.f32 %v2315_v0, %v2315_v0  ;;  %v2322_v32 = vsub.f32 %v2308_v43, %v2315_v0 }
0x14a4   : > { %v2318_v48 = vpop.xlane.xlu1 %2317 }
0x14a5   : > { %v2319_v50 = vmul.f32 0.03125, %v2318_v48 }
0x14a7   : > { %v2321_v51 = vsub.f32 %v2319_v50, %v2320_v49 }
0x14a9   : > { %v2323_v52 = vadd.f32 1e-05, %v2321_v51 }
0x14ab   : > { %3110 = vrsqrt.f32 %v2323_v52 }
0x14b5   : > { %v3111_v30 = vpop.eup %3110 }
0x14b6   : > { %v2325_v55 = vmul.f32 %v3111_v30, %v2322_v32 }
0x14b8   : > { %v2332_v56 = vmul.f32 %v2649_v54, %v2325_v55 }
0x14ba   : > { %v2339_v60 = vadd.f32 %v2650_v44, %v2332_v56 }
0x14bc   : > { %v2343_v61 = vmul.f32 %v2341_v58, %v2339_v60  ;;  %v2342_v62 = vmul.f32 %v2340_v59, %v2339_v60 }
0x14be   : > { %2346 = vadd.xlane.f32.xlu1 %v2343_v61  ;;  %2344 = vadd.xlane.f32.xlu0 %v2342_v62 }
0x154b   : > { %v2347_v63 = vpop.xlane.xlu1 %2346  ;;  %v2345_v2 = vpop.xlane.xlu0 %2344 }
0x154c   : > { %v2357_v3 = vrot.slane %v2347_v63, %v2352_v35  ;;  %v2353_v4 = vrot.slane %v2345_v2, %v2352_v35 }
0x154e   : > { %v2359_v5 = vsel %vm2358_vm5, %v2357_v3, %v2353_v4 }
0x154f   : > { %2362 = vst.msk [vmem:[%s538_s17] sm:$0x3] %vm2361_vm6, %v2359_v5 }
0x1550 PF: > { %s26_s18 = sadd.s32 1, %s3150_s18  }
0x1551   : > { %p23_p3 = scmp.ge.s32.totalorder %s26_s18, 4  }
0x1553   :  { %25 = sbr.rel (!%p23_p3) target bundleno = 1 (0x1), region = 133 }
0x155a   :  { %2382 = vsyncpa [#allocation3], 1 }
0x155b   :  { %2384 = vsyncpa [#allocation3 + $0x1], 1 }

</bundles_post_ra>
